<compile_context>
chip_gen: v7x
topology: tpu7x:2x2x1
jax: 0.10.0
libtpu: 0.0.40
codegen_flags: <defaults>
</compile_context>

<pallas_src>
import math
import functools

import jax
import jax.numpy as jnp
from jax.experimental import pallas as pl
from jax.experimental.pallas import tpu as pltpu


def _pma_kernel(qp_ref, k_ref, wkv_ref, bkv_ref, wo_ref, bo_ref, o_ref,
                *, num_heads, dim_V, tb, nq, nk):
    """MAB forward for a block of `tb` batch elements (batch flattened onto the M axis).

    qp_ref holds the batch-invariant projected query (nq, dim_V); everything else is
    per-block K data plus the fused K/V and output-MLP weights.
    """
    ds = dim_V // num_heads
    scale = 1.0 / math.sqrt(dim_V)   # PyTorch module scales by sqrt(dim_V), not sqrt(ds)

    # Fused K/V projection: (tb*nk, dim_K) @ (dim_K, 2*dim_V) on the MXU, f32 accumulate.
    KVp = (jnp.dot(k_ref[...], wkv_ref[...], preferred_element_type=jnp.float32)
           + bkv_ref[...])
    KV3 = KVp.reshape(tb, nk, 2 * dim_V)

    Qp = qp_ref[...].astype(jnp.float32)                              # (nq, dim_V)
    Qs_b = jnp.broadcast_to((Qp * scale)[None], (tb, nq, dim_V))      # hoisted once

    # Per-head attention (static unroll).  Head outputs stay in registers and are
    # concatenated on the lane axis once -- no 8-lane masked stores into VMEM scratch
    # and no extra VMEM round trip before the output MLP.
    pv = []
    for h in range(num_heads):
        lo = h * ds
        Kh = KV3[:, :, lo:lo + ds]                          # (tb, nk, ds)
        Vh = KV3[:, :, dim_V + lo:dim_V + lo + ds]          # (tb, nk, ds)

        # Scores: contract last axes directly (no K transpose relayout), batched over tb.
        S = jnp.einsum("bqd,bkd->bqk", Qs_b[:, :, lo:lo + ds], Kh,
                       preferred_element_type=jnp.float32)
        S = S - jnp.max(S, axis=-1, keepdims=True)
        P = jnp.exp(S)
        A = P * pl.reciprocal(jnp.sum(P, axis=-1, keepdims=True), approx=False)
        pv.append(jnp.einsum("bqk,bkd->bqd", A, Vh,
                             preferred_element_type=jnp.float32))

    # Residual with the (batch-invariant) projected query, then output MLP with residual.
    O = Qp[None, :, :] + jnp.concatenate(pv, axis=-1)       # (tb, nq, dim_V), f32
    O2 = O.reshape(tb * nq, dim_V)
    Oo = (jnp.dot(O2.astype(wo_ref.dtype), wo_ref[...],
                  preferred_element_type=jnp.float32) + bo_ref[...])
    o_ref[...] = (O2 + jnp.maximum(Oo, 0.0)).astype(o_ref.dtype)


def _num_grid_steps():
    """One grid step per TensorCore: 1 on single-TC chips (v5e/v6e), 2 on v7x."""
    try:
        kind = jax.devices()[0].device_kind.lower()
    except Exception:
        return 1
    return 2 if ("v7" in kind or "tpu7" in kind) else 1


def _choose_tb(B, Nq, Nk, n_steps, max_rows=8192):
    """Largest tb dividing B such that flattened block rows are 8-aligned (or tb == B),
    the block stays under max_rows rows, and the grid has >= n_steps steps
    (n_steps = TensorCores per chip; the grid is a sequential loop per core)."""
    divisors = [d for d in range(1, B + 1) if B % d == 0]

    def ok(d):
        return d == B or ((d * Nq) % 8 == 0 and (d * Nk) % 8 == 0)

    cands = [d for d in divisors if ok(d) and d * max(Nq, Nk) <= max_rows]
    if not cands:
        cands = [d for d in divisors if ok(d)] or [B]
    target = [d for d in cands if B // d >= n_steps]
    return max(target) if target else max(cands)


def pma_forward(X, params, *, num_heads, tb=None, use_bf16_matmul=False):
    """PMA forward: X (B, N, dim) -> (B, num_seeds, dim)."""
    B, Nk, dim_K = X.shape
    S = params["S"]                                  # (1, num_seeds, dim)
    Nq = S.shape[1]
    dim_V = params["wq"].shape[1]
    assert dim_V % num_heads == 0

    # Batch-invariant query projection: computed ONCE here (not B times in the kernel).
    Qp = (S.reshape(Nq, dim_K) @ params["wq"] + params["bq"]).astype(jnp.float32)

    # Fused K/V projection weights (one wide matmul instead of two on the K side).
    wkv = jnp.concatenate([params["wk"], params["wv"]], axis=1)   # (dim_K, 2*dim_V)
    bkv = jnp.concatenate([params["bk"], params["bv"]], axis=1)   # (1, 2*dim_V)
    wo, bo = params["wo"], params["bo"]

    out_dtype = X.dtype
    K2 = X.reshape(B * Nk, dim_K)
    if use_bf16_matmul:
        # bf16 MXU operands; biases and all post-matmul math stay f32 (accumulate f32).
        K2 = K2.astype(jnp.bfloat16)
        wkv = wkv.astype(jnp.bfloat16)
        wo = wo.astype(jnp.bfloat16)

    if tb is None:
        tb = _choose_tb(B, Nq, Nk, _num_grid_steps())
    assert B % tb == 0
    assert tb == B or ((tb * Nq) % 8 == 0 and (tb * Nk) % 8 == 0), \
        "tb*Nq and tb*Nk must be multiples of 8 (or tb == B)"

    kernel = functools.partial(_pma_kernel, num_heads=num_heads, dim_V=dim_V,
                               tb=tb, nq=Nq, nk=Nk)
    const2d = lambda shape: pl.BlockSpec(shape, lambda b: (0, 0))

    out2 = pl.pallas_call(
        kernel,
        out_shape=jax.ShapeDtypeStruct((B * Nq, dim_V), out_dtype),
        grid_spec=pltpu.PrefetchScalarGridSpec(
            num_scalar_prefetch=0,
            grid=(B // tb,),
            in_specs=[
                const2d((Nq, dim_V)),                                 # Qp (batch-invariant)
                pl.BlockSpec((tb * Nk, dim_K), lambda b: (b, 0)),     # X (flattened batch)
                const2d((dim_K, 2 * dim_V)), const2d((1, 2 * dim_V)), # wkv, bkv (fused)
                const2d((dim_V, dim_V)), const2d((1, dim_V)),         # wo, bo
            ],
            out_specs=pl.BlockSpec((tb * Nq, dim_V), lambda b: (b, 0)),
        ),
        compiler_params=pltpu.CompilerParams(
            dimension_semantics=("parallel",)),
    )(Qp, K2, wkv, bkv, wo, bo)

    return out2.reshape(B, Nq, dim_V)


# ----------------------------- pure-JAX reference ---------------------------------

def mab_reference(Q, K, params, *, num_heads):
    """Mirrors the PyTorch MAB.forward exactly (ln=False)."""
    dim_V = params["wq"].shape[1]
    ds = dim_V // num_heads
    B = Q.shape[0]

    Qp = Q @ params["wq"] + params["bq"]
    Kp = K @ params["wk"] + params["bk"]
    Vp = K @ params["wv"] + params["bv"]

    split = lambda X: jnp.concatenate(
        [X[:, :, h * ds:(h + 1) * ds] for h in range(num_heads)], axis=0)
    Q_, K_, V_ = split(Qp), split(Kp), split(Vp)

    A = jax.nn.softmax(jnp.einsum("bqd,bkd->bqk", Q_, K_) / math.sqrt(dim_V), axis=2)
    O_ = Q_ + jnp.einsum("bqk,bkd->bqd", A, V_)
    O = jnp.concatenate([O_[h * B:(h + 1) * B] for h in range(num_heads)], axis=2)
    O = O + jax.nn.relu(O @ params["wo"] + params["bo"])
    return O


def pma_reference(X, params, *, num_heads):
    B = X.shape[0]
    Q = jnp.broadcast_to(params["S"], (B,) + params["S"].shape[1:])
    return mab_reference(Q, X, params, num_heads=num_heads)


def init_params(key, *, dim, num_seeds):
    """Deterministic init: xavier-uniform seeds + PyTorch-Linear-style weights (in, out)."""
    def linear(k, fan_in, fan_out):
        k1, k2 = jax.random.split(k)
        bound = 1.0 / math.sqrt(fan_in)
        w = jax.random.uniform(k1, (fan_in, fan_out), jnp.float32, -bound, bound)
        b = jax.random.uniform(k2, (1, fan_out), jnp.float32, -bound, bound)
        return w, b

    ks, kq, kk, kv, ko = jax.random.split(key, 5)
    xb = math.sqrt(6.0 / (num_seeds + dim))
    S = jax.random.uniform(ks, (1, num_seeds, dim), jnp.float32, -xb, xb)
    wq, bq = linear(kq, dim, dim)
    wk, bk = linear(kk, dim, dim)
    wv, bv = linear(kv, dim, dim)
    wo, bo = linear(ko, dim, dim)
    return dict(S=S, wq=wq, bq=bq, wk=wk, bk=bk, wv=wv, bv=bv, wo=wo, bo=bo)


if __name__ == "__main__":
    # Small shapes consistent with the module: batch of 8 sets, 16 elements/set,
    # hidden dim 32, 4 heads, 8 pooling seeds.
    B, N = 8, 16
    dim, num_heads, num_seeds = 32, 4, 8

    key = jax.random.PRNGKey(0)
    k_params, k_x = jax.random.split(key)
    params = init_params(k_params, dim=dim, num_seeds=num_seeds)

    X = jax.random.normal(k_x, (B, N, dim), jnp.float32)

    out = jax.block_until_ready(pma_forward(X, params, num_heads=num_heads))
    ref = pma_reference(X, params, num_heads=num_heads)

    assert out.shape == (B, num_seeds, dim)
    err = jnp.max(jnp.abs(out - ref))
    assert jnp.allclose(out, ref, rtol=1e-3, atol=1e-3), f"max abs err = {err}"
    print("KERNEL_OK")
</pallas_src>

<mosaic_0001>
module attributes {stable_mosaic.version = 11 : i64} {
  func.func @_pma_kernel(%arg0: i32, %arg1: memref<8x32xf32, #tpu.memory_space<vmem>>, %arg2: memref<128x32xf32, #tpu.memory_space<vmem>>, %arg3: memref<32x64xf32, #tpu.memory_space<vmem>>, %arg4: memref<1x64xf32, #tpu.memory_space<vmem>>, %arg5: memref<32x32xf32, #tpu.memory_space<vmem>>, %arg6: memref<1x32xf32, #tpu.memory_space<vmem>>, %arg7: memref<64x32xf32, #tpu.memory_space<vmem>>) attributes {dimension_semantics = [#tpu.dimension_semantics<parallel>], iteration_bounds = array<i64: 1>, scalar_prefetch = 0 : i64, scratch_operands = 0 : i64, tpu.core_type = #tpu.core_type<tc>, window_params = [{pipeline_mode = #tpu.pipeline_mode<synchronous>, transform_indices = @transform_0, window_bounds = array<i64: 8, 32>}, {transform_indices = @transform_1, window_bounds = array<i64: 128, 32>}, {pipeline_mode = #tpu.pipeline_mode<synchronous>, transform_indices = @transform_2, window_bounds = array<i64: 32, 64>}, {pipeline_mode = #tpu.pipeline_mode<synchronous>, transform_indices = @transform_3, window_bounds = array<i64: 1, 64>}, {pipeline_mode = #tpu.pipeline_mode<synchronous>, transform_indices = @transform_4, window_bounds = array<i64: 32, 32>}, {pipeline_mode = #tpu.pipeline_mode<synchronous>, transform_indices = @transform_5, window_bounds = array<i64: 1, 32>}, {transform_indices = @transform_6, window_bounds = array<i64: 64, 32>}]} {
    %c0 = arith.constant 0 : index
    %c0_0 = arith.constant 0 : index
    %0 = vector.load %arg2[%c0, %c0_0] : memref<128x32xf32, #tpu.memory_space<vmem>>, vector<128x32xf32>
    %c0_1 = arith.constant 0 : index
    %c0_2 = arith.constant 0 : index
    %1 = vector.load %arg3[%c0_1, %c0_2] : memref<32x64xf32, #tpu.memory_space<vmem>>, vector<32x64xf32>
    %cst = arith.constant dense<0.000000e+00> : vector<128x64xf32>
    %2 = tpu.matmul %0, %1, %cst {dimension_numbers = #tpu.dot_dimension_numbers<[1], [0], [0], [1], [0, 0, 1, 1], [], []>} : vector<128x32xf32>, vector<32x64xf32>, vector<128x64xf32> -> vector<128x64xf32>
    %c0_3 = arith.constant 0 : index
    %c0_4 = arith.constant 0 : index
    %3 = vector.load %arg4[%c0_3, %c0_4] : memref<1x64xf32, #tpu.memory_space<vmem>>, vector<1x64xf32>
    %4 = vector.broadcast %3 : vector<1x64xf32> to vector<128x64xf32>
    %5 = arith.addf %2, %4 : vector<128x64xf32>
    %6 = vector.shape_cast %5 : vector<128x64xf32> to vector<8x16x64xf32>
    %c0_5 = arith.constant 0 : index
    %c0_6 = arith.constant 0 : index
    %7 = vector.load %arg1[%c0_5, %c0_6] : memref<8x32xf32, #tpu.memory_space<vmem>>, vector<8x32xf32>
    %cst_7 = arith.constant 0.176776692 : f32
    %8 = vector.broadcast %cst_7 : f32 to vector<8x32xf32>
    %9 = arith.mulf %7, %8 : vector<8x32xf32>
    %10 = vector.shape_cast %9 : vector<8x32xf32> to vector<1x8x32xf32>
    %11 = vector.shape_cast %10 : vector<1x8x32xf32> to vector<1x8x32xf32>
    %12 = vector.broadcast %11 : vector<1x8x32xf32> to vector<8x8x32xf32>
    %13 = vector.extract_strided_slice %6 {offsets = [0, 0, 0], sizes = [8, 16, 8], strides = [1, 1, 1]} : vector<8x16x64xf32> to vector<8x16x8xf32>
    %14 = vector.extract_strided_slice %6 {offsets = [0, 0, 32], sizes = [8, 16, 8], strides = [1, 1, 1]} : vector<8x16x64xf32> to vector<8x16x8xf32>
    %15 = vector.extract_strided_slice %12 {offsets = [0, 0, 0], sizes = [8, 8, 8], strides = [1, 1, 1]} : vector<8x8x32xf32> to vector<8x8x8xf32>
    "tpu.trace_start"() <{level = 10 : i32, message = "bqd,bkd->bqk"}> : () -> ()
    %cst_8 = arith.constant dense<0.000000e+00> : vector<8x8x16xf32>
    %16 = tpu.matmul %15, %13, %cst_8 {dimension_numbers = #tpu.dot_dimension_numbers<[2], [2], [1], [1], [0, 0, 0, 1, 1, 1], [0], [0]>} : vector<8x8x8xf32>, vector<8x16x8xf32>, vector<8x8x16xf32> -> vector<8x8x16xf32>
    "tpu.trace_stop"() : () -> ()
    %cst_9 = arith.constant dense<0xFF800000> : vector<8x8xf32>
    %17 = vector.multi_reduction <maximumf>, %16, %cst_9 [2] : vector<8x8x16xf32> to vector<8x8xf32>
    %18 = vector.shape_cast %17 : vector<8x8xf32> to vector<8x8x1xf32>
    %19 = vector.broadcast %18 : vector<8x8x1xf32> to vector<8x8x16xf32>
    %20 = arith.subf %16, %19 : vector<8x8x16xf32>
    %21 = math.exp %20 : vector<8x8x16xf32>
    %cst_10 = arith.constant dense<0.000000e+00> : vector<8x8xf32>
    %22 = vector.multi_reduction <add>, %21, %cst_10 [2] : vector<8x8x16xf32> to vector<8x8xf32>
    %23 = vector.shape_cast %22 : vector<8x8xf32> to vector<8x8x1xf32>
    %24 = tpu.reciprocal %23 : vector<8x8x1xf32> -> vector<8x8x1xf32>
    %25 = vector.broadcast %24 : vector<8x8x1xf32> to vector<8x8x16xf32>
    %26 = arith.mulf %21, %25 : vector<8x8x16xf32>
    "tpu.trace_start"() <{level = 10 : i32, message = "bqk,bkd->bqd"}> : () -> ()
    %cst_11 = arith.constant dense<0.000000e+00> : vector<8x8x8xf32>
    %27 = tpu.matmul %26, %14, %cst_11 {dimension_numbers = #tpu.dot_dimension_numbers<[2], [1], [1], [2], [0, 0, 0, 1, 1, 2], [0], [0]>} : vector<8x8x16xf32>, vector<8x16x8xf32>, vector<8x8x8xf32> -> vector<8x8x8xf32>
    "tpu.trace_stop"() : () -> ()
    %28 = vector.extract_strided_slice %6 {offsets = [0, 0, 8], sizes = [8, 16, 8], strides = [1, 1, 1]} : vector<8x16x64xf32> to vector<8x16x8xf32>
    %29 = vector.extract_strided_slice %6 {offsets = [0, 0, 40], sizes = [8, 16, 8], strides = [1, 1, 1]} : vector<8x16x64xf32> to vector<8x16x8xf32>
    %30 = vector.extract_strided_slice %12 {offsets = [0, 0, 8], sizes = [8, 8, 8], strides = [1, 1, 1]} : vector<8x8x32xf32> to vector<8x8x8xf32>
    "tpu.trace_start"() <{level = 10 : i32, message = "bqd,bkd->bqk"}> : () -> ()
    %cst_12 = arith.constant dense<0.000000e+00> : vector<8x8x16xf32>
    %31 = tpu.matmul %30, %28, %cst_12 {dimension_numbers = #tpu.dot_dimension_numbers<[2], [2], [1], [1], [0, 0, 0, 1, 1, 1], [0], [0]>} : vector<8x8x8xf32>, vector<8x16x8xf32>, vector<8x8x16xf32> -> vector<8x8x16xf32>
    "tpu.trace_stop"() : () -> ()
    %cst_13 = arith.constant dense<0xFF800000> : vector<8x8xf32>
    %32 = vector.multi_reduction <maximumf>, %31, %cst_13 [2] : vector<8x8x16xf32> to vector<8x8xf32>
    %33 = vector.shape_cast %32 : vector<8x8xf32> to vector<8x8x1xf32>
    %34 = vector.broadcast %33 : vector<8x8x1xf32> to vector<8x8x16xf32>
    %35 = arith.subf %31, %34 : vector<8x8x16xf32>
    %36 = math.exp %35 : vector<8x8x16xf32>
    %cst_14 = arith.constant dense<0.000000e+00> : vector<8x8xf32>
    %37 = vector.multi_reduction <add>, %36, %cst_14 [2] : vector<8x8x16xf32> to vector<8x8xf32>
    %38 = vector.shape_cast %37 : vector<8x8xf32> to vector<8x8x1xf32>
    %39 = tpu.reciprocal %38 : vector<8x8x1xf32> -> vector<8x8x1xf32>
    %40 = vector.broadcast %39 : vector<8x8x1xf32> to vector<8x8x16xf32>
    %41 = arith.mulf %36, %40 : vector<8x8x16xf32>
    "tpu.trace_start"() <{level = 10 : i32, message = "bqk,bkd->bqd"}> : () -> ()
    %cst_15 = arith.constant dense<0.000000e+00> : vector<8x8x8xf32>
    %42 = tpu.matmul %41, %29, %cst_15 {dimension_numbers = #tpu.dot_dimension_numbers<[2], [1], [1], [2], [0, 0, 0, 1, 1, 2], [0], [0]>} : vector<8x8x16xf32>, vector<8x16x8xf32>, vector<8x8x8xf32> -> vector<8x8x8xf32>
    "tpu.trace_stop"() : () -> ()
    %43 = vector.extract_strided_slice %6 {offsets = [0, 0, 16], sizes = [8, 16, 8], strides = [1, 1, 1]} : vector<8x16x64xf32> to vector<8x16x8xf32>
    %44 = vector.extract_strided_slice %6 {offsets = [0, 0, 48], sizes = [8, 16, 8], strides = [1, 1, 1]} : vector<8x16x64xf32> to vector<8x16x8xf32>
    %45 = vector.extract_strided_slice %12 {offsets = [0, 0, 16], sizes = [8, 8, 8], strides = [1, 1, 1]} : vector<8x8x32xf32> to vector<8x8x8xf32>
    "tpu.trace_start"() <{level = 10 : i32, message = "bqd,bkd->bqk"}> : () -> ()
    %cst_16 = arith.constant dense<0.000000e+00> : vector<8x8x16xf32>
    %46 = tpu.matmul %45, %43, %cst_16 {dimension_numbers = #tpu.dot_dimension_numbers<[2], [2], [1], [1], [0, 0, 0, 1, 1, 1], [0], [0]>} : vector<8x8x8xf32>, vector<8x16x8xf32>, vector<8x8x16xf32> -> vector<8x8x16xf32>
    "tpu.trace_stop"() : () -> ()
    %cst_17 = arith.constant dense<0xFF800000> : vector<8x8xf32>
    %47 = vector.multi_reduction <maximumf>, %46, %cst_17 [2] : vector<8x8x16xf32> to vector<8x8xf32>
    %48 = vector.shape_cast %47 : vector<8x8xf32> to vector<8x8x1xf32>
    %49 = vector.broadcast %48 : vector<8x8x1xf32> to vector<8x8x16xf32>
    %50 = arith.subf %46, %49 : vector<8x8x16xf32>
    %51 = math.exp %50 : vector<8x8x16xf32>
    %cst_18 = arith.constant dense<0.000000e+00> : vector<8x8xf32>
    %52 = vector.multi_reduction <add>, %51, %cst_18 [2] : vector<8x8x16xf32> to vector<8x8xf32>
    %53 = vector.shape_cast %52 : vector<8x8xf32> to vector<8x8x1xf32>
    %54 = tpu.reciprocal %53 : vector<8x8x1xf32> -> vector<8x8x1xf32>
    %55 = vector.broadcast %54 : vector<8x8x1xf32> to vector<8x8x16xf32>
    %56 = arith.mulf %51, %55 : vector<8x8x16xf32>
    "tpu.trace_start"() <{level = 10 : i32, message = "bqk,bkd->bqd"}> : () -> ()
    %cst_19 = arith.constant dense<0.000000e+00> : vector<8x8x8xf32>
    %57 = tpu.matmul %56, %44, %cst_19 {dimension_numbers = #tpu.dot_dimension_numbers<[2], [1], [1], [2], [0, 0, 0, 1, 1, 2], [0], [0]>} : vector<8x8x16xf32>, vector<8x16x8xf32>, vector<8x8x8xf32> -> vector<8x8x8xf32>
    "tpu.trace_stop"() : () -> ()
    %58 = vector.extract_strided_slice %6 {offsets = [0, 0, 24], sizes = [8, 16, 8], strides = [1, 1, 1]} : vector<8x16x64xf32> to vector<8x16x8xf32>
    %59 = vector.extract_strided_slice %6 {offsets = [0, 0, 56], sizes = [8, 16, 8], strides = [1, 1, 1]} : vector<8x16x64xf32> to vector<8x16x8xf32>
    %60 = vector.extract_strided_slice %12 {offsets = [0, 0, 24], sizes = [8, 8, 8], strides = [1, 1, 1]} : vector<8x8x32xf32> to vector<8x8x8xf32>
    "tpu.trace_start"() <{level = 10 : i32, message = "bqd,bkd->bqk"}> : () -> ()
    %cst_20 = arith.constant dense<0.000000e+00> : vector<8x8x16xf32>
    %61 = tpu.matmul %60, %58, %cst_20 {dimension_numbers = #tpu.dot_dimension_numbers<[2], [2], [1], [1], [0, 0, 0, 1, 1, 1], [0], [0]>} : vector<8x8x8xf32>, vector<8x16x8xf32>, vector<8x8x16xf32> -> vector<8x8x16xf32>
    "tpu.trace_stop"() : () -> ()
    %cst_21 = arith.constant dense<0xFF800000> : vector<8x8xf32>
    %62 = vector.multi_reduction <maximumf>, %61, %cst_21 [2] : vector<8x8x16xf32> to vector<8x8xf32>
    %63 = vector.shape_cast %62 : vector<8x8xf32> to vector<8x8x1xf32>
    %64 = vector.broadcast %63 : vector<8x8x1xf32> to vector<8x8x16xf32>
    %65 = arith.subf %61, %64 : vector<8x8x16xf32>
    %66 = math.exp %65 : vector<8x8x16xf32>
    %cst_22 = arith.constant dense<0.000000e+00> : vector<8x8xf32>
    %67 = vector.multi_reduction <add>, %66, %cst_22 [2] : vector<8x8x16xf32> to vector<8x8xf32>
    %68 = vector.shape_cast %67 : vector<8x8xf32> to vector<8x8x1xf32>
    %69 = tpu.reciprocal %68 : vector<8x8x1xf32> -> vector<8x8x1xf32>
    %70 = vector.broadcast %69 : vector<8x8x1xf32> to vector<8x8x16xf32>
    %71 = arith.mulf %66, %70 : vector<8x8x16xf32>
    "tpu.trace_start"() <{level = 10 : i32, message = "bqk,bkd->bqd"}> : () -> ()
    %cst_23 = arith.constant dense<0.000000e+00> : vector<8x8x8xf32>
    %72 = tpu.matmul %71, %59, %cst_23 {dimension_numbers = #tpu.dot_dimension_numbers<[2], [1], [1], [2], [0, 0, 0, 1, 1, 2], [0], [0]>} : vector<8x8x16xf32>, vector<8x16x8xf32>, vector<8x8x8xf32> -> vector<8x8x8xf32>
    "tpu.trace_stop"() : () -> ()
    %73 = vector.shape_cast %7 : vector<8x32xf32> to vector<1x8x32xf32>
    %74 = tpu.concatenate %27, %42, %57, %72 in 2 : vector<8x8x8xf32>, vector<8x8x8xf32>, vector<8x8x8xf32>, vector<8x8x8xf32> -> vector<8x8x32xf32>
    %75 = vector.broadcast %73 : vector<1x8x32xf32> to vector<8x8x32xf32>
    %76 = arith.addf %75, %74 : vector<8x8x32xf32>
    %77 = vector.shape_cast %76 : vector<8x8x32xf32> to vector<64x32xf32>
    %c0_24 = arith.constant 0 : index
    %c0_25 = arith.constant 0 : index
    %78 = vector.load %arg5[%c0_24, %c0_25] : memref<32x32xf32, #tpu.memory_space<vmem>>, vector<32x32xf32>
    %cst_26 = arith.constant dense<0.000000e+00> : vector<64x32xf32>
    %79 = tpu.matmul %77, %78, %cst_26 {dimension_numbers = #tpu.dot_dimension_numbers<[1], [0], [0], [1], [0, 0, 1, 1], [], []>} : vector<64x32xf32>, vector<32x32xf32>, vector<64x32xf32> -> vector<64x32xf32>
    %c0_27 = arith.constant 0 : index
    %c0_28 = arith.constant 0 : index
    %80 = vector.load %arg6[%c0_27, %c0_28] : memref<1x32xf32, #tpu.memory_space<vmem>>, vector<1x32xf32>
    %81 = vector.broadcast %80 : vector<1x32xf32> to vector<64x32xf32>
    %82 = arith.addf %79, %81 : vector<64x32xf32>
    %cst_29 = arith.constant 0.000000e+00 : f32
    %83 = vector.broadcast %cst_29 : f32 to vector<64x32xf32>
    %84 = arith.maximumf %82, %83 : vector<64x32xf32>
    %85 = arith.addf %77, %84 : vector<64x32xf32>
    %c0_30 = arith.constant 0 : index
    %c0_31 = arith.constant 0 : index
    %86 = vector.load %arg7[%c0_30, %c0_31] : memref<64x32xf32, #tpu.memory_space<vmem>>, vector<64x32xf32>
    tpu.vector_store %arg7[%c0_30, %c0_31], %85 {strides = array<i32>} : memref<64x32xf32, #tpu.memory_space<vmem>>, vector<64x32xf32>,
    return
  }
  func.func @transform_0(%arg0: i32) -> (i32, i32) {
    %c0_i32 = arith.constant 0 : i32
    %c0_i32_0 = arith.constant 0 : i32
    %c0_i32_1 = arith.constant 0 : i32
    return %c0_i32, %c0_i32_0 : i32, i32
  }
  func.func @transform_1(%arg0: i32) -> (i32, i32) {
    %c0_i32 = arith.constant 0 : i32
    %c0_i32_0 = arith.constant 0 : i32
    return %arg0, %c0_i32 : i32, i32
  }
  func.func @transform_2(%arg0: i32) -> (i32, i32) {
    %c0_i32 = arith.constant 0 : i32
    %c0_i32_0 = arith.constant 0 : i32
    %c0_i32_1 = arith.constant 0 : i32
    return %c0_i32, %c0_i32_0 : i32, i32
  }
  func.func @transform_3(%arg0: i32) -> (i32, i32) {
    %c0_i32 = arith.constant 0 : i32
    %c0_i32_0 = arith.constant 0 : i32
    %c0_i32_1 = arith.constant 0 : i32
    return %c0_i32, %c0_i32_0 : i32, i32
  }
  func.func @transform_4(%arg0: i32) -> (i32, i32) {
    %c0_i32 = arith.constant 0 : i32
    %c0_i32_0 = arith.constant 0 : i32
    %c0_i32_1 = arith.constant 0 : i32
    return %c0_i32, %c0_i32_0 : i32, i32
  }
  func.func @transform_5(%arg0: i32) -> (i32, i32) {
    %c0_i32 = arith.constant 0 : i32
    %c0_i32_0 = arith.constant 0 : i32
    %c0_i32_1 = arith.constant 0 : i32
    return %c0_i32, %c0_i32_0 : i32, i32
  }
  func.func @transform_6(%arg0: i32) -> (i32, i32) {
    %c0_i32 = arith.constant 0 : i32
    %c0_i32_0 = arith.constant 0 : i32
    return %arg0, %c0_i32 : i32, i32
  }
}

</mosaic_0001>

<bundles_post_ra>
// kernel: tpu_custom_call.1
= control target key start
LH: loop header
LB: loop body
LE: loop exit
PB: predicated region body
PF: predicated region fallthrough
CT: control target
= control target key end

     0   :  { %vm50_vm0 = vcmask 261120   ;;  %v7464_v22 = vmov 0.0|0.0   ;;  %vm7465_vm1 = vmmov 0   ;;  %v7466_v23 = vmov 0.0   ;;  %s7467_s13 = smov 96   ;;  %s7468_s14 = smov 120   ;;  %s8480_s2 = inlined_call_operand.vmem [shape: f32[32,64], index: 2, kind: input, shape index: {}]   ;;  %s8481_s1 = inlined_call_operand.vmem [shape: f32[128,32], index: 1, kind: input, shape index: {}]   ;;  %s8482_s3 = inlined_call_operand.vmem [shape: f32[1,64], index: 3, kind: input, shape index: {}]   ;;  %s8483_s0 = inlined_call_operand.vmem [shape: f32[8,32], index: 0, kind: input, shape index: {}]   ;;  %s8484_s4 = inlined_call_operand.vmem [shape: f32[32,32], index: 4, kind: input, shape index: {}]   ;;  %s8485_s5 = inlined_call_operand.vmem [shape: f32[1,32], index: 5, kind: input, shape index: {}]   ;;  %s8486_s6 = inlined_call_operand.vmem [shape: f32[64,32], index: 6, kind: output, shape index: {}]  }
   0x1   :  { %v39_v0 = vld [vmem:[%s8480_s2] sm:$0xff]  ;;  %v40_v1 = vld [vmem:[%s8480_s2 + $0x8] sm:$0xff]  ;;  %v41_v2 = vld [vmem:[%s8480_s2 + $0x10] sm:$0xff]  ;;  %vm246_vm2 = vcmask 64512   ;;  %vm858_vm4 = vcmask 130048   ;;  %s7469_s15 = smov 88  }
   0x2   :  { %v6798_v3 = vpack.c.bf16 %v40_v1, %v39_v0  ;;  %v42_v4 = vld [vmem:[%s8480_s2 + $0x18] sm:$0xff]  ;;  %v23_v5 = vld [vmem:[%s8481_s1] sm:$0xff]  ;;  %v24_v8 = vld [vmem:[%s8481_s1 + $0x8] sm:$0xff]  ;;  %s7470_s16 = smov 112   ;;  %s7471_s17 = smov 80   ;;  %vm5735_vm5 = vcmask 195584  }
   0x3   :  { %v6802_v6 = vpack.c.bf16 %v42_v4, %v41_v2  ;;  %6306 = vmatprep.mubr.msk.f32.mxu0 %vm50_vm0, %v23_v5  ;;  %v35_v7 = vld [vmem:[%s8481_s1 + $0x60] sm:$0xff]  ;;  %v36_v9 = vld [vmem:[%s8481_s1 + $0x68] sm:$0xff]  ;;  %v25_v10 = vld [vmem:[%s8481_s1 + $0x10] sm:$0xff]  ;;  %s7472_s18 = smov 104   ;;  %s7473_s19 = smov 72  }
   0x4   :  { %6799 = vmatprep.subr.bf16.mxu0 %v6798_v3  ;;  %7038 = vmatprep.subr.bf16.mxu1 %v6798_v3  ;;  %v37_v11 = vld [vmem:[%s8481_s1 + $0x70] sm:$0xff]  ;;  %v26_v12 = vld [vmem:[%s8481_s1 + $0x18] sm:$0xff]  ;;  %v27_v14 = vld [vmem:[%s8481_s1 + $0x20] sm:$0xff]  ;;  %s7474_s20 = smov 8   ;;  %s7475_s21 = smov 16  }
   0x5   :  { %6801 = vmatpush3.bf16.msra.mxu0 %v6798_v3  ;;  %7040 = vmatpush3.bf16.msra.mxu1 %v6798_v3  ;;  %v38_v13 = vld [vmem:[%s8481_s1 + $0x78] sm:$0xff]  ;;  %v28_v15 = vld [vmem:[%s8481_s1 + $0x28] sm:$0xff]  ;;  %v29_v16 = vld [vmem:[%s8481_s1 + $0x30] sm:$0xff]  ;;  %s7476_s30 = smov 24  }
   0x6   :  { %6803 = vmatprep.subr.bf16.mxu0 %v6802_v6  ;;  %7039 = vmatprep.subr.bf16.mxu1 %v6802_v6  ;;  %v30_v17 = vld [vmem:[%s8481_s1 + $0x38] sm:$0xff]  ;;  %v31_v18 = vld [vmem:[%s8481_s1 + $0x40] sm:$0xff]  ;;  %v32_v19 = vld [vmem:[%s8481_s1 + $0x48] sm:$0xff] }
   0x7   :  { %6324 = vmatprep.mubr.msk.f32.mxu1 %vm50_vm0, %v35_v7  ;;  %v33_v20 = vld [vmem:[%s8481_s1 + $0x50] sm:$0xff]  ;;  %v34_v21 = vld [vmem:[%s8481_s1 + $0x58] sm:$0xff]  ;;  %v7597_v24 = vld [vmem:[%s8482_s3] ss:$0 sm:$0xff] }
   0x8   :  { %vm7609_vm3 = vmpackc.low %vm246_vm2, %vm246_vm2  ;;  %v244_v34 = vld [vmem:[%s8483_s0] sm:$0xff] }
   0x9   :  { %6805 = vmatpush3.bf16.msra.mxu0 %v6802_v6  ;;  %7041 = vmatpush3.bf16.msra.mxu1 %v6802_v6  ;;  %v7633_v46 = vmul.f32 0.17677669, %v244_v34 }
   0xa   :  { %6806 = vmatprep.subr.bf16.mxu1 %v7464_v22  ;;  %6822 = vmatprep.subr.bf16.mxu0 %v7464_v22 }
   0xc   :  { %6307 = vmatmul.mubr.msk.f32.vlgmr.msra.gmra.mrb[0].mxu0 %vm50_vm0, %v24_v8  ;;  %6325 = vmatmul.mubr.msk.f32.vlgmr.msra.gmra.mrb[0].mxu1 %vm50_vm0, %v36_v9 }
   0xd   :  { %6309 = vmatprep.mubr.msk.f32.mxu0 %vm50_vm0, %v25_v10  ;;  %6327 = vmatprep.mubr.msk.f32.mxu1 %vm50_vm0, %v37_v11 }
  0x10   :  { %6310 = vmatmul.mubr.msk.f32.gmra.mrb[2].mxu0 %vm50_vm0, %v26_v12  ;;  %6328 = vmatmul.mubr.msk.f32.gmra.mrb[2].mxu1 %vm50_vm0, %v38_v13 }
  0x11   :  { %6312 = vmatprep.mubr.msk.f32.mxu0 %vm50_vm0, %v27_v14  ;;  %6334 = vmatprep.mubr.msk.f32.mxu1 %vm7465_vm1, %v7466_v23 }
  0x14   :  { %6313 = vmatmul.mubr.msk.f32.gmra.mrb[4].mxu0 %vm50_vm0, %v28_v15 }
  0x15   :  { %6315 = vmatprep.mubr.msk.f32.mxu0 %vm50_vm0, %v29_v16 }
  0x18   :  { %6316 = vmatmul.mubr.msk.f32.gmra.mrb[6].mxu0 %vm50_vm0, %v30_v17 }
  0x19   :  { %6318 = vmatprep.mubr.msk.f32.mxu0 %vm50_vm0, %v31_v18 }
  0x1c   :  { %6319 = vmatmul.mubr.msk.f32.gmra.mrb[8].mxu0 %vm50_vm0, %v32_v19 }
  0x1d   :  { %6321 = vmatprep.mubr.msk.f32.mxu0 %vm50_vm0, %v33_v20 }
  0x20   :  { %6322 = vmatmul.mubr.msk.f32.gmra.mrb[10].mxu0 %vm50_vm0, %v34_v21 }
  0x21   :  { %6362 = vmatprep.mubr.msk.f32.mxu0 %vm7465_vm1, %v7466_v23 }
  0xdf   :  { %v6308_v25 = vpop.f32.mrb[0].mxu0  ;;  %v6326_v26 = vpop.f32.mrb[0].mxu1 }
  0xe0   :  { %v171_v27 = vadd.f32 %v6308_v25, %v7597_v24  ;;  %v165_v28 = vpop.f32.mrb[1].mxu0  ;;  %v7601_v29 = vadd.f32 %v6326_v26, %v7597_v24  ;;  %v225_v30 = vpop.f32.mrb[1].mxu1 }
  0xe1   :  { %v166_v31 = vadd.f32 %v7597_v24, %v165_v28  ;;  %v7605_v32 = vadd.f32 %v7597_v24, %v225_v30 }
  0xe3   :  { %v6311_v35 = vpop.f32.mrb[2].mxu0  ;;  %v7616_v36 = vpack.i.bf16 %v171_v27, %v166_v31  ;;  %v6807_v37 = vpack.c.bf16 %v171_v27, %v166_v31  ;;  %v6831_v38 = vpack.c.bf16 %v7601_v29, %v7605_v32  ;;  %v6329_v39 = vpop.f32.mrb[2].mxu1  ;;  %v7622_v40 = vpack.i.bf16 %v7601_v29, %v7605_v32 }
  0xe4   :  { %v181_v41 = vadd.f32 %v6311_v35, %v7597_v24  ;;  %v175_v42 = vpop.f32.mrb[3].mxu0  ;;  %v7626_v43 = vadd.f32 %v6329_v39, %v7597_v24  ;;  %v235_v44 = vpop.f32.mrb[3].mxu1 }
  0xe5   :  { %v176_v45 = vadd.f32 %v7597_v24, %v175_v42  ;;  %7056 = vrot.lane.b32.xlu0 %v7616_v36, %s7467_s13  ;;  %6809 = vmatpush3.bf16.xpose.msk.msra.mxu1 %vm7609_vm3, %v6807_v37  ;;  %v236_v47 = vadd.f32 %v7597_v24, %v235_v44 }
  0xe6   :  { %6810 = vmatprep.subr.bf16.mxu1 %v7464_v22 }
  0xe7   :  { %v6314_v48 = vpop.f32.mrb[4].mxu0  ;;  %v7637_v49 = vpack.i.bf16 %v181_v41, %v176_v45  ;;  %v6811_v50 = vpack.c.bf16 %v181_v41, %v176_v45  ;;  %v6835_v51 = vpack.c.bf16 %v7626_v43, %v236_v47  ;;  %v7641_v52 = vpack.i.bf16 %v7626_v43, %v236_v47 }
  0xe8   :  { %v191_v53 = vadd.f32 %v6314_v48, %v7597_v24  ;;  %v185_v54 = vpop.f32.mrb[5].mxu0 }
  0xe9   :  { %v186_v55 = vadd.f32 %v7597_v24, %v185_v54  ;;  %7061 = vrot.lane.b32.xlu1 %v7637_v49, %s7467_s13 }
  0xeb   :  { %v6317_v56 = vpop.f32.mrb[6].mxu0  ;;  %v7647_v57 = vpack.i.bf16 %v191_v53, %v186_v55  ;;  %v6815_v58 = vpack.c.bf16 %v191_v53, %v186_v55 }
  0xec   :  { %v201_v59 = vadd.f32 %v6317_v56, %v7597_v24  ;;  %v195_v60 = vpop.f32.mrb[7].mxu0  ;;  %6335 = vmatmul.mubr.msk.f32.vlgmr.msra.gmra.mrb[4].mxu1 %vm246_vm2, %v7633_v46 }
  0xed   :  { %v196_v61 = vadd.f32 %v7597_v24, %v195_v60  ;;  %7066 = vrot.lane.b32.xlu1 %v7647_v57, %s7467_s13  ;;  %6813 = vmatpush3.bf16.xpose.msk.msra.mxu1 %vm7609_vm3, %v6811_v50 }
  0xee   :  { %6341 = vmatprep.mubr.msk.f32.mxu1 %vm7465_vm1, %v7466_v23  ;;  %6814 = vmatprep.subr.bf16.mxu1 %v7464_v22 }
  0xef   :  { %v6320_v62 = vpop.f32.mrb[8].mxu0  ;;  %v7660_v63 = vpack.i.bf16 %v201_v59, %v196_v61  ;;  %v6819_v0 = vpack.c.bf16 %v201_v59, %v196_v61 }
  0xf0   :  { %v211_v1 = vadd.f32 %v6320_v62, %v7597_v24  ;;  %v205_v2 = vpop.f32.mrb[9].mxu0 }
  0xf1   :  { %v206_v3 = vadd.f32 %v7597_v24, %v205_v2  ;;  %7071 = vrot.lane.b32.xlu1 %v7660_v63, %s7467_s13 }
  0xf3   :  { %v6823_v4 = vpack.c.bf16 %v211_v1, %v206_v3  ;;  %v7666_v5 = vpack.i.bf16 %v211_v1, %v206_v3  ;;  %v6323_v6 = vpop.f32.mrb[10].mxu0 }
  0xf4   :  { %6342 = vmatmul.mubr.msk.f32.vlgmr.msra.gmra.mrb[6].mxu1 %vm246_vm2, %v7633_v46  ;;  %v221_v7 = vadd.f32 %v6323_v6, %v7597_v24  ;;  %v215_v8 = vpop.f32.mrb[11].mxu0 }
  0xf5   :  { %6825 = vmatpush3.bf16.xpose.msk.msra.mxu0 %vm7609_vm3, %v6823_v4  ;;  %7076 = vrot.lane.b32.xlu0 %v7666_v5, %s7467_s13  ;;  %v216_v9 = vadd.f32 %v7597_v24, %v215_v8 }
  0xf6   :  { %6817 = vmatpush3.bf16.xpose.msk.msra.mxu1 %vm7609_vm3, %v6815_v58  ;;  %6348 = vmatprep.mubr.msk.f32.mxu1 %vm7465_vm1, %v7466_v23 }
  0xf7   :  { %6818 = vmatprep.subr.bf16.mxu1 %v7464_v22  ;;  %6830 = vmatprep.subr.bf16.mxu0 %v7464_v22  ;;  %v6827_v10 = vpack.c.bf16 %v221_v7, %v216_v9  ;;  %v7682_v11 = vpack.i.bf16 %v221_v7, %v216_v9 }
  0xf9   :  { %7081 = vrot.lane.b32.xlu1 %v7682_v11, %s7467_s13 }
  0xfc   :  { %6363 = vmatmul.mubr.msk.f32.vlgmr.msra.gmra.mrb[12].mxu0 %vm246_vm2, %v7633_v46 }
  0xfd   :  { %6349 = vmatmul.mubr.msk.f32.vlgmr.msra.gmra.mrb[8].mxu1 %vm246_vm2, %v7633_v46  ;;  %6833 = vmatpush3.bf16.xpose.msk.msra.mxu0 %vm7609_vm3, %v6831_v38 }
  0xfe   :  { %6821 = vmatpush3.bf16.xpose.msk.msra.mxu1 %vm7609_vm3, %v6819_v0  ;;  %6355 = vmatprep.mubr.msk.f32.mxu1 %vm7465_vm1, %v7466_v23 }
  0xff   :  { %6376 = vmatprep.mubr.msk.f32.mxu0 %vm7465_vm1, %v7466_v23  ;;  %6826 = vmatprep.subr.bf16.mxu1 %v7464_v22 }
 0x100   :  { %6838 = vmatprep.subr.bf16.mxu0 %v7464_v22 }
 0x104   :  { %6377 = vmatmul.mubr.msk.f32.vlgmr.msra.gmra.mrb[14].mxu0 %vm246_vm2, %v7633_v46 }
 0x105   :  { %6356 = vmatmul.mubr.msk.f32.vlgmr.msra.gmra.mrb[10].mxu1 %vm246_vm2, %v7633_v46  ;;  %6390 = vmatprep.mubr.msk.f32.mxu0 %vm7465_vm1, %v7466_v23 }
 0x106   :  { %6829 = vmatpush3.bf16.xpose.msk.msra.mxu1 %vm7609_vm3, %v6827_v10  ;;  %6369 = vmatprep.mubr.msk.f32.mxu1 %vm7465_vm1, %v7466_v23 }
 0x107   :  { %6834 = vmatprep.subr.bf16.mxu1 %v7464_v22 }
 0x10d   :  { %6370 = vmatmul.mubr.msk.f32.vlgmr.msra.gmra.mrb[12].mxu1 %vm246_vm2, %v7633_v46 }
 0x10e   :  { %6837 = vmatpush3.bf16.xpose.msk.msra.mxu1 %vm7609_vm3, %v6835_v51  ;;  %6383 = vmatprep.mubr.msk.f32.mxu1 %vm7465_vm1, %v7466_v23 }
 0x10f   :  { %6841 = vmatprep.subr.bf16.mxu1 %v7464_v22 }
 0x115   :  { %6384 = vmatmul.mubr.msk.f32.vlgmr.msra.gmra.mrb[14].mxu1 %vm246_vm2, %v7633_v46 }
 0x116   :  { %6397 = vmatprep.mubr.msk.f32.mxu1 %vm7465_vm1, %v7466_v23 }
 0x157   :  { %v7057_v12 = vpop.permute.xlu0 %7056 }
 0x158   :  { %v7059_v13 = vunpack.i.h.bf16 %v7057_v12  ;;  %v7058_v14 = vunpack.i.l.bf16 %v7057_v12 }
 0x15a   :  { %v6839_v15 = vpack.c.bf16 %v7059_v13, %v7058_v14 }
 0x15b   :  { %v7062_v16 = vpop.permute.xlu1 %7061 }
 0x15c   :  { %v7064_v17 = vunpack.i.h.bf16 %v7062_v16  ;;  %v7063_v18 = vunpack.i.l.bf16 %v7062_v16  ;;  %6840 = vmatpush3.bf16.msra.mxu0 %v6839_v15 }
 0x15d   :  { %6844 = vmatprep.subr.bf16.mxu0 %v7464_v22 }
 0x15e   :  { %v6842_v19 = vpack.c.bf16 %v7064_v17, %v7063_v18 }
 0x15f   :  { %v7741_v55 = vpop.permute.xlu1 %7066 }
 0x160   :  { %6843 = vmatpush3.bf16.msra.mxu1 %v6842_v19 }
 0x161   :  { %6847 = vmatprep.subr.bf16.mxu1 %v7464_v22 }
 0x163   :  { %v7743_v59 = vpop.permute.xlu1 %7071 }
 0x167   :  { %v7739_v51 = vpop.permute.xlu0 %7076 }
 0x16b   :  { %v7745_v62 = vpop.permute.xlu1 %7081 }
 0x1bf   :  { %v322_v20 = vpop.f32.mrb[4].mxu1 }
 0x1c0   :  { %v859_v21 = vsel %vm858_vm4, %v322_v20, -inf  ;;  %v6336_v24 = vpop.f32.mrb[5].mxu1 }
 0x1c1   :  { %860 = vmax.xlane.f32.xlu0 %v859_v21 }
 0x1c7   :  { %v398_v25 = vpop.f32.mrb[6].mxu1 }
 0x1c8   :  { %v862_v26 = vsel %vm858_vm4, %v398_v25, -inf  ;;  %v6343_v27 = vpop.f32.mrb[7].mxu1 }
 0x1c9   :  { %863 = vmax.xlane.f32.xlu0 %v862_v26 }
 0x1cf   :  { %v626_v28 = vpop.f32.mrb[12].mxu0 }
 0x1d0   :  { %v474_v29 = vpop.f32.mrb[8].mxu1  ;;  %v871_v30 = vsel %vm858_vm4, %v626_v28, -inf  ;;  %v6364_v31 = vpop.f32.mrb[13].mxu0 }
 0x1d1   :  { %872 = vmax.xlane.f32.xlu0 %v871_v30  ;;  %v865_v32 = vsel %vm858_vm4, %v474_v29, -inf  ;;  %v6350_v34 = vpop.f32.mrb[9].mxu1 }
 0x1d2   :  { %866 = vmax.xlane.f32.xlu1 %v865_v32 }
 0x1d7   :  { %v7728_v35 = vpop.f32.mrb[14].mxu0 }
 0x1d8   :  { %v550_v37 = vpop.f32.mrb[10].mxu1  ;;  %v877_v38 = vsel %vm858_vm4, %v7728_v35, -inf  ;;  %v6378_v39 = vpop.f32.mrb[15].mxu0 }
 0x1d9   :  { %878 = vmax.xlane.f32.xlu0 %v877_v38  ;;  %v868_v41 = vsel %vm858_vm4, %v550_v37, -inf  ;;  %v6357_v42 = vpop.f32.mrb[11].mxu1 }
 0x1da   :  { %869 = vmax.xlane.f32.xlu1 %v868_v41 }
 0x1e0   :  { %v702_v43 = vpop.f32.mrb[12].mxu1 }
 0x1e1   :  { %v874_v44 = vsel %vm858_vm4, %v702_v43, -inf  ;;  %v6371_v45 = vpop.f32.mrb[13].mxu1 }
 0x1e2   :  { %875 = vmax.xlane.f32.xlu1 %v874_v44  ;;  %v7069_v45 = vunpack.i.h.bf16 %v7741_v55 }
 0x1e8   :  { %v854_v47 = vpop.f32.mrb[14].mxu1 }
 0x1e9   :  { %v880_v48 = vsel %vm858_vm4, %v854_v47, -inf  ;;  %v6385_v50 = vpop.f32.mrb[15].mxu1 }
 0x1ea   :  { %881 = vmax.xlane.f32.xlu1 %v880_v48 }
 0x1ef   :  { %7086 = vrot.lane.b32.xlu0 %v7622_v40, %s7467_s13 }
 0x1fb   :  { %7091 = vrot.lane.b32.xlu1 %v7641_v52, %s7467_s13 }
 0x24e   :  { %v861_v53 = vpop.xlane.xlu0 %860 }
 0x24f   :  { %v883_v54 = vsub.f32 %v322_v20, %v861_v53 }
 0x251   :  { %v891_v56 = vmul.f32 1.442695, %v883_v54  ;;  %v7074_v54 = vunpack.i.h.bf16 %v7743_v59 }
 0x253   :  { %7335 = vpow2.f32 %v891_v56  ;;  %v7073_v56 = vunpack.i.l.bf16 %v7743_v59  ;;  %v7078_v59 = vunpack.i.l.bf16 %v7739_v51 }
 0x256   :  { %v864_v58 = vpop.xlane.xlu0 %863 }
 0x257   :  { %v884_v60 = vsub.f32 %v398_v25, %v864_v58 }
 0x259   :  { %v893_v61 = vmul.f32 1.442695, %v884_v60 }
 0x25b   :  { %7337 = vpow2.f32 %v893_v61  ;;  %v6848_v61 = vpack.c.bf16 %v7074_v54, %v7073_v56 }
 0x25d   :  { %v7747_v0 = vpop.eup %7335 }
 0x25e   :  { %v873_v1 = vpop.xlane.xlu0 %872  ;;  %v907_v2 = vsel %vm858_vm4, %v7747_v0, 0.0 }
 0x25f   :  { %v887_v3 = vsub.f32 %v626_v28, %v873_v1  ;;  %v867_v4 = vpop.xlane.xlu1 %866  ;;  %908 = vadd.xlane.f32.xlu0 %v907_v2  ;;  %v7079_v2 = vunpack.i.h.bf16 %v7739_v51  ;;  %v7084_v51 = vunpack.i.h.bf16 %v7745_v62 }
 0x260   :  { %v885_v6 = vsub.f32 %v474_v29, %v867_v4 }
 0x261   :  { %v899_v7 = vmul.f32 1.442695, %v887_v3 }
 0x262   :  { %v895_v8 = vmul.f32 1.442695, %v885_v6  ;;  %v6851_v6 = vpack.c.bf16 %v7079_v2, %v7078_v59 }
 0x264   :  { %7339 = vpow2.f32 %v895_v8 }
 0x265   :  { %v7751_v9 = vpop.eup %7337  ;;  %7341 = vpow2.f32 %v899_v7 }
 0x266   :  { %v910_v10 = vsel %vm858_vm4, %v7751_v9, 0.0  ;;  %v879_v28 = vpop.xlane.xlu0 %878 }
 0x267   :  { %v870_v12 = vpop.xlane.xlu1 %869  ;;  %911 = vadd.xlane.f32.xlu1 %v910_v10  ;;  %v889_v29 = vsub.f32 %v7728_v35, %v879_v28 }
 0x268   :  { %v886_v13 = vsub.f32 %v550_v37, %v870_v12 }
 0x269   :  { %v903_v30 = vmul.f32 1.442695, %v889_v29 }
 0x26a   :  { %v897_v14 = vmul.f32 1.442695, %v886_v13  ;;  %v7087_v35 = vpop.permute.xlu0 %7086  ;;  %v7083_v13 = vunpack.i.l.bf16 %v7745_v62 }
 0x26b   :  { %v7089_v7 = vunpack.i.h.bf16 %v7087_v35  ;;  %v7088_v8 = vunpack.i.l.bf16 %v7087_v35 }
 0x26c   :  { %7343 = vpow2.f32 %v897_v14 }
 0x26d   :  { %v6857_v14 = vpack.c.bf16 %v7089_v7, %v7088_v8 }
 0x26e   :  { %v7755_v15 = vpop.eup %7339 }
 0x26f   :  { %v876_v16 = vpop.xlane.xlu1 %875  ;;  %v913_v17 = vsel %vm858_vm4, %v7755_v15, 0.0  ;;  %v7759_v18 = vpop.eup %7341 }
 0x270   :  { %v888_v19 = vsub.f32 %v702_v43, %v876_v16  ;;  %914 = vadd.xlane.f32.xlu0 %v913_v17  ;;  %v919_v21 = vsel %vm858_vm4, %v7759_v18, 0.0  ;;  %v6854_v17 = vpack.c.bf16 %v7084_v51, %v7083_v13 }
 0x272   :  { %v901_v20 = vmul.f32 1.442695, %v888_v19 }
 0x274   :  { %7345 = vpow2.f32 %v901_v20  ;;  %920 = vadd.xlane.f32.xlu0 %v919_v21 }
 0x275   :  { %7347 = vpow2.f32 %v903_v30 }
 0x276   :  { %v7763_v24 = vpop.eup %7343 }
 0x277   :  { %v916_v25 = vsel %vm858_vm4, %v7763_v24, 0.0  ;;  %v882_v31 = vpop.xlane.xlu1 %881 }
 0x278   :  { %917 = vadd.xlane.f32.xlu1 %v916_v25  ;;  %v890_v32 = vsub.f32 %v854_v47, %v882_v31  ;;  %v7068_v47 = vunpack.i.l.bf16 %v7741_v55 }
 0x27a   :  { %v905_v34 = vmul.f32 1.442695, %v890_v32  ;;  %v6845_v53 = vpack.c.bf16 %v7069_v45, %v7068_v47 }
 0x27b   :  { %v7092_v43 = vpop.permute.xlu1 %7091 }
 0x27c   :  { %7349 = vpow2.f32 %v905_v34  ;;  %v7094_v62 = vunpack.i.h.bf16 %v7092_v43 }
 0x27e   :  { %v7767_v26 = vpop.eup %7345 }
 0x27f   :  { %v922_v27 = vsel %vm858_vm4, %v7767_v26, 0.0  ;;  %v7774_v37 = vpop.eup %7347 }
 0x280   :  { %923 = vadd.xlane.f32.xlu1 %v922_v27  ;;  %v925_v38 = vsel %vm858_vm4, %v7774_v37, 0.0 }
 0x286   :  { %v7778_v39 = vpop.eup %7349 }
 0x287   :  { %v928_v41 = vsel %vm858_vm4, %v7778_v39, 0.0 }
 0x28a   :  { %7096 = vrot.lane.b32.xlu0 %v7616_v36, %s7468_s14 }
 0x291   :  { %7101 = vrot.lane.b32.xlu1 %v7637_v49, %s7468_s14 }
 0x2a9   :  { %926 = vadd.xlane.f32.xlu0 %v925_v38 }
 0x2b5   :  { %929 = vadd.xlane.f32.xlu1 %v928_v41 }
 0x2bf   :  { %7106 = vrot.lane.b32.xlu0 %v7647_v57, %s7468_s14 }
 0x2c3   :  { %1579 = vrot.lane.b32.xlu0 %v7633_v46, %s7468_s14 }
 0x2c6   :  { %7111 = vrot.lane.b32.xlu1 %v7660_v63, %s7468_s14 }
 0x2c7   :  { %7121 = vrot.lane.b32.xlu0 %v7682_v11, %s7468_s14 }
 0x2ca   :  { %7116 = vrot.lane.b32.xlu1 %v7666_v5, %s7468_s14 }
 0x2cb   :  { %7131 = vrot.lane.b32.xlu0 %v7641_v52, %s7468_s14 }
 0x2ce   :  { %7126 = vrot.lane.b32.xlu1 %v7622_v40, %s7468_s14 }
 0x2ec   :  { %v909_v42 = vpop.xlane.xlu0 %908 }
 0x2ed   :  { %7351 = vrcp.f32 %v909_v42 }
 0x2f4   :  { %v912_v44 = vpop.xlane.xlu1 %911 }
 0x2f5   :  { %7353 = vrcp.f32 %v912_v44 }
 0x2f7   :  { %v7352_v48 = vpop.eup %7351 }
 0x2f8   :  { %v939_v50 = vmul.f32 %v7352_v48, %v7747_v0 }
 0x2fa   :  { %6391 = vmatmul.mubr.msk.f32.vlgmr.msra.gmra.mrb[16].mxu0 %vm858_vm4, %v939_v50 }
 0x2fb   :  { %6846 = vmatpush3.bf16.msra.mxu0 %v6845_v53  ;;  %6404 = vmatprep.mubr.msk.f32.mxu0 %vm7465_vm1, %v7466_v23 }
 0x2fc   :  { %6850 = vmatprep.subr.bf16.mxu0 %v7464_v22 }
 0x2fd   :  { %v915_v58 = vpop.xlane.xlu0 %914 }
 0x2fe   :  { %7355 = vrcp.f32 %v915_v58 }
 0x2ff   :  { %v7354_v55 = vpop.eup %7353 }
 0x300   :  { %v940_v60 = vmul.f32 %v7354_v55, %v7751_v9 }
 0x301   :  { %v921_v0 = vpop.xlane.xlu0 %920 }
 0x302   :  { %7357 = vrcp.f32 %v921_v0  ;;  %6398 = vmatmul.mubr.msk.f32.vlgmr.msra.gmra.mrb[16].mxu1 %vm858_vm4, %v940_v60 }
 0x303   :  { %6849 = vmatpush3.bf16.msra.mxu1 %v6848_v61  ;;  %6411 = vmatprep.mubr.msk.f32.mxu1 %vm7465_vm1, %v7466_v23 }
 0x304   :  { %6853 = vmatprep.subr.bf16.mxu1 %v7464_v22 }
 0x305   :  { %v918_v1 = vpop.xlane.xlu1 %917 }
 0x306   :  { %7359 = vrcp.f32 %v918_v1 }
 0x308   :  { %v7356_v3 = vpop.eup %7355 }
 0x309   :  { %v941_v4 = vmul.f32 %v7356_v3, %v7755_v15 }
 0x30b   :  { %6405 = vmatmul.mubr.msk.f32.vlgmr.msra.gmra.mrb[18].mxu0 %vm858_vm4, %v941_v4 }
 0x30c   :  { %v7358_v9 = vpop.eup %7357  ;;  %6852 = vmatpush3.bf16.msra.mxu0 %v6851_v6  ;;  %6418 = vmatprep.mubr.msk.f32.mxu0 %vm7465_vm1, %v7466_v23 }
 0x30d   :  { %v924_v10 = vpop.xlane.xlu1 %923  ;;  %6856 = vmatprep.subr.bf16.mxu0 %v7464_v22  ;;  %v943_v12 = vmul.f32 %v7358_v9, %v7759_v18  ;;  %v7093_v18 = vunpack.i.l.bf16 %v7092_v43 }
 0x30e   :  { %7361 = vrcp.f32 %v924_v10 }
 0x30f   :  { %6419 = vmatmul.mubr.msk.f32.vlgmr.msra.gmra.mrb[20].mxu0 %vm858_vm4, %v943_v12  ;;  %v6860_v21 = vpack.c.bf16 %v7094_v62, %v7093_v18 }
 0x310   :  { %v7360_v15 = vpop.eup %7359  ;;  %6858 = vmatpush3.bf16.msra.mxu0 %v6857_v14  ;;  %6432 = vmatprep.mubr.msk.f32.mxu0 %vm7465_vm1, %v7466_v23 }
 0x311   :  { %v942_v16 = vmul.f32 %v7360_v15, %v7763_v24  ;;  %6862 = vmatprep.subr.bf16.mxu0 %v7464_v22  ;;  %v7097_v24 = vpop.permute.xlu0 %7096  ;;  %v7102_v27 = vpop.permute.xlu1 %7101 }
 0x312   :  { %v7099_v28 = vunpack.i.h.bf16 %v7097_v24  ;;  %v7098_v29 = vunpack.i.l.bf16 %v7097_v24  ;;  %v7104_v42 = vunpack.i.h.bf16 %v7102_v27  ;;  %v7103_v43 = vunpack.i.l.bf16 %v7102_v27 }
 0x313   :  { %6412 = vmatmul.mubr.msk.f32.vlgmr.msra.gmra.mrb[18].mxu1 %vm858_vm4, %v942_v16 }
 0x314   :  { %6855 = vmatpush3.bf16.msra.mxu1 %v6854_v17  ;;  %6425 = vmatprep.mubr.msk.f32.mxu1 %vm7465_vm1, %v7466_v23  ;;  %v6867_v50 = vpack.c.bf16 %v7104_v42, %v7103_v43 }
 0x315   :  { %6859 = vmatprep.subr.bf16.mxu1 %v7464_v22 }
 0x318   :  { %v7362_v19 = vpop.eup %7361 }
 0x319   :  { %v944_v20 = vmul.f32 %v7362_v19, %v7767_v26  ;;  %v6863_v26 = vpack.c.bf16 %v7099_v28, %v7098_v29 }
 0x31b   :  { %6426 = vmatmul.mubr.msk.f32.vlgmr.msra.gmra.mrb[20].mxu1 %vm858_vm4, %v944_v20 }
 0x31c   :  { %6861 = vmatpush3.bf16.msra.mxu1 %v6860_v21  ;;  %6439 = vmatprep.mubr.msk.f32.mxu1 %vm7465_vm1, %v7466_v23 }
 0x31d   :  { %6866 = vmatprep.subr.bf16.mxu1 %v7464_v22 }
 0x336   :  { %v927_v25 = vpop.xlane.xlu0 %926 }
 0x337   :  { %7363 = vrcp.f32 %v927_v25 }
 0x33a   :  { %v7107_v34 = vpop.permute.xlu0 %7106 }
 0x33b   :  { %v7109_v41 = vunpack.i.h.bf16 %v7107_v34  ;;  %v7108_v35 = vunpack.i.l.bf16 %v7107_v34 }
 0x33d   :  { %v6871_v44 = vpack.c.bf16 %v7109_v41, %v7108_v35 }
 0x341   :  { %v7364_v30 = vpop.eup %7363 }
 0x342   :  { %v930_v31 = vpop.xlane.xlu1 %929  ;;  %v945_v32 = vmul.f32 %v7364_v30, %v7774_v37  ;;  %v1580_v37 = vpop.permute.xlu0 %1579 }
 0x343   :  { %7365 = vrcp.f32 %v930_v31 }
 0x344   :  { %6433 = vmatmul.mubr.msk.f32.vlgmr.msra.gmra.mrb[22].mxu0 %vm858_vm4, %v945_v32 }
 0x345   :  { %6865 = vmatpush3.bf16.xpose.msk.msra.mxu0 %vm7609_vm3, %v6863_v26  ;;  %6446 = vmatprep.mubr.msk.f32.mxu0 %vm7465_vm1, %v7466_v23 }
 0x346   :  { %v7112_v38 = vpop.permute.xlu1 %7111  ;;  %6870 = vmatprep.subr.bf16.mxu0 %v7464_v22  ;;  %v7122_v1 = vpop.permute.xlu0 %7121 }
 0x347   :  { %v7114_v56 = vunpack.i.h.bf16 %v7112_v38  ;;  %v7113_v58 = vunpack.i.l.bf16 %v7112_v38  ;;  %v7124_v2 = vunpack.i.h.bf16 %v7122_v1  ;;  %v7123_v59 = vunpack.i.l.bf16 %v7122_v1 }
 0x349   :  { %v6883_v4 = vpack.c.bf16 %v7124_v2, %v7123_v59 }
 0x34a   :  { %v7117_v45 = vpop.permute.xlu1 %7116  ;;  %v7132_v6 = vpop.permute.xlu0 %7131 }
 0x34b   :  { %v7119_v53 = vunpack.i.h.bf16 %v7117_v45  ;;  %v7118_v54 = vunpack.i.l.bf16 %v7117_v45  ;;  %v7134_v7 = vunpack.i.h.bf16 %v7132_v6  ;;  %v7133_v8 = vunpack.i.l.bf16 %v7132_v6 }
 0x34c   :  { %6447 = vmatmul.mubr.msk.f32.vlgmr.msra.gmra.mrb[24].mxu0 %vm246_vm2, %v1580_v37 }
 0x34d   :  { %v7366_v47 = vpop.eup %7365  ;;  %6873 = vmatpush3.bf16.xpose.msk.msra.mxu0 %vm7609_vm3, %v6871_v44  ;;  %6460 = vmatprep.mubr.msk.f32.mxu0 %vm7465_vm1, %v7466_v23  ;;  %v6879_v55 = vpack.c.bf16 %v7119_v53, %v7118_v54  ;;  %v6891_v9 = vpack.c.bf16 %v7134_v7, %v7133_v8 }
 0x34e   :  { %v946_v48 = vmul.f32 %v7366_v47, %v7778_v39  ;;  %6878 = vmatprep.subr.bf16.mxu0 %v7464_v22  ;;  %v7127_v60 = vpop.permute.xlu1 %7126  ;;  %v6875_v39 = vpack.c.bf16 %v7114_v56, %v7113_v58 }
 0x34f   :  { %v7129_v61 = vunpack.i.h.bf16 %v7127_v60  ;;  %v7128_v0 = vunpack.i.l.bf16 %v7127_v60 }
 0x350   :  { %6440 = vmatmul.mubr.msk.f32.vlgmr.msra.gmra.mrb[22].mxu1 %vm858_vm4, %v946_v48 }
 0x351   :  { %6869 = vmatpush3.bf16.xpose.msk.msra.mxu1 %vm7609_vm3, %v6867_v50  ;;  %6453 = vmatprep.mubr.msk.f32.mxu1 %vm7465_vm1, %v7466_v23  ;;  %v6887_v3 = vpack.c.bf16 %v7129_v61, %v7128_v0 }
 0x352   :  { %6874 = vmatprep.subr.bf16.mxu1 %v7464_v22 }
 0x354   :  { %6461 = vmatmul.mubr.msk.f32.vlgmr.msra.gmra.mrb[26].mxu0 %vm246_vm2, %v1580_v37 }
 0x355   :  { %6881 = vmatpush3.bf16.xpose.msk.msra.mxu0 %vm7609_vm3, %v6879_v55  ;;  %6474 = vmatprep.mubr.msk.f32.mxu0 %vm7465_vm1, %v7466_v23 }
 0x356   :  { %6886 = vmatprep.subr.bf16.mxu0 %v7464_v22 }
 0x358   :  { %6454 = vmatmul.mubr.msk.f32.vlgmr.msra.gmra.mrb[24].mxu1 %vm246_vm2, %v1580_v37 }
 0x359   :  { %6877 = vmatpush3.bf16.xpose.msk.msra.mxu1 %vm7609_vm3, %v6875_v39  ;;  %6467 = vmatprep.mubr.msk.f32.mxu1 %vm7465_vm1, %v7466_v23 }
 0x35a   :  { %6882 = vmatprep.subr.bf16.mxu1 %v7464_v22 }
 0x35c   :  { %6475 = vmatmul.mubr.msk.f32.vlgmr.msra.gmra.mrb[28].mxu0 %vm246_vm2, %v1580_v37 }
 0x35d   :  { %6889 = vmatpush3.bf16.xpose.msk.msra.mxu0 %vm7609_vm3, %v6887_v3  ;;  %6488 = vmatprep.mubr.msk.f32.mxu0 %vm7465_vm1, %v7466_v23 }
 0x35e   :  { %6894 = vmatprep.subr.bf16.mxu0 %v7464_v22 }
 0x360   :  { %6468 = vmatmul.mubr.msk.f32.vlgmr.msra.gmra.mrb[26].mxu1 %vm246_vm2, %v1580_v37 }
 0x361   :  { %6885 = vmatpush3.bf16.xpose.msk.msra.mxu1 %vm7609_vm3, %v6883_v4  ;;  %6481 = vmatprep.mubr.msk.f32.mxu1 %vm7465_vm1, %v7466_v23 }
 0x362   :  { %6890 = vmatprep.subr.bf16.mxu1 %v7464_v22 }
 0x364   :  { %6489 = vmatmul.mubr.msk.f32.vlgmr.msra.gmra.mrb[30].mxu0 %vm246_vm2, %v1580_v37 }
 0x365   :  { %6502 = vmatprep.mubr.msk.f32.mxu0 %vm7465_vm1, %v7466_v23 }
 0x368   :  { %6482 = vmatmul.mubr.msk.f32.vlgmr.msra.gmra.mrb[28].mxu1 %vm246_vm2, %v1580_v37 }
 0x369   :  { %6893 = vmatpush3.bf16.xpose.msk.msra.mxu1 %vm7609_vm3, %v6891_v9  ;;  %6495 = vmatprep.mubr.msk.f32.mxu1 %vm7465_vm1, %v7466_v23 }
 0x36a   :  { %6897 = vmatprep.subr.bf16.mxu1 %v7464_v22 }
 0x370   :  { %6496 = vmatmul.mubr.msk.f32.vlgmr.msra.gmra.mrb[30].mxu1 %vm246_vm2, %v1580_v37 }
 0x371   :  { %6509 = vmatprep.mubr.msk.f32.mxu1 %vm7465_vm1, %v7466_v23 }
 0x3cd   :  { %v7883_v10 = vpop.f32.mrb[16].mxu0 }
 0x3ce   :  { %v6392_v12 = vpop.f32.mrb[17].mxu0 }
 0x3d5   :  { %v7885_v51 = vpop.f32.mrb[16].mxu1 }
 0x3d6   :  { %v6399_v13 = vpop.f32.mrb[17].mxu1 }
 0x3de   :  { %v7887_v14 = vpop.f32.mrb[18].mxu0 }
 0x3df   :  { %v6406_v15 = vpop.f32.mrb[19].mxu0 }
 0x3e2   :  { %v7889_v16 = vpop.f32.mrb[20].mxu0 }
 0x3e3   :  { %v6420_v17 = vpop.f32.mrb[21].mxu0 }
 0x3e6   :  { %v7891_v62 = vpop.f32.mrb[18].mxu1 }
 0x3e7   :  { %v6413_v18 = vpop.f32.mrb[19].mxu1 }
 0x3ee   :  { %v7893_v19 = vpop.f32.mrb[20].mxu1 }
 0x3ef   :  { %v6427_v20 = vpop.f32.mrb[21].mxu1 }
 0x417   :  { %v7895_v21 = vpop.f32.mrb[22].mxu0 }
 0x418   :  { %v6434_v24 = vpop.f32.mrb[23].mxu0 }
 0x41f   :  { %v1657_v25 = vpop.f32.mrb[24].mxu0 }
 0x420   :  { %v2207_v27 = vsel %vm858_vm4, %v1657_v25, -inf  ;;  %v6448_v28 = vpop.f32.mrb[25].mxu0 }
 0x421   :  { %2208 = vmax.xlane.f32.xlu1 %v2207_v27 }
 0x423   :  { %v7898_v29 = vpop.f32.mrb[22].mxu1 }
 0x424   :  { %v6441_v30 = vpop.f32.mrb[23].mxu1 }
 0x427   :  { %v1813_v31 = vpop.f32.mrb[26].mxu0 }
 0x428   :  { %v2213_v32 = vsel %vm858_vm4, %v1813_v31, -inf  ;;  %v6462_v26 = vpop.f32.mrb[27].mxu0 }
 0x429   :  { %2214 = vmax.xlane.f32.xlu0 %v2213_v32 }
 0x42b   :  { %v1735_v34 = vpop.f32.mrb[24].mxu1 }
 0x42c   :  { %v2210_v38 = vsel %vm858_vm4, %v1735_v34, -inf  ;;  %v6455_v41 = vpop.f32.mrb[25].mxu1 }
 0x42d   :  { %2211 = vmax.xlane.f32.xlu0 %v2210_v38 }
 0x42f   :  { %v1969_v35 = vpop.f32.mrb[28].mxu0 }
 0x430   :  { %v6476_v42 = vpop.f32.mrb[29].mxu0  ;;  %v2219_v43 = vsel %vm858_vm4, %v1969_v35, -inf }
 0x431   :  { %2220 = vmax.xlane.f32.xlu1 %v2219_v43 }
 0x433   :  { %v1891_v44 = vpop.f32.mrb[26].mxu1 }
 0x434   :  { %v6469_v37 = vpop.f32.mrb[27].mxu1  ;;  %v2216_v45 = vsel %vm858_vm4, %v1891_v44, -inf }
 0x435   :  { %2217 = vmax.xlane.f32.xlu0 %v2216_v45 }
 0x437   :  { %v2125_v47 = vpop.f32.mrb[30].mxu0 }
 0x438   :  { %v6490_v48 = vpop.f32.mrb[31].mxu0  ;;  %v2225_v50 = vsel %vm858_vm4, %v2125_v47, -inf }
 0x439   :  { %2226 = vmax.xlane.f32.xlu1 %v2225_v50 }
 0x43b   :  { %v2047_v53 = vpop.f32.mrb[28].mxu1 }
 0x43c   :  { %v6483_v54 = vpop.f32.mrb[29].mxu1  ;;  %v2222_v56 = vsel %vm858_vm4, %v2047_v53, -inf }
 0x43d   :  { %2223 = vmax.xlane.f32.xlu0 %v2222_v56 }
 0x443   :  { %v7906_v58 = vpop.f32.mrb[30].mxu1 }
 0x444   :  { %v6497_v55 = vpop.f32.mrb[31].mxu1  ;;  %v2228_v60 = vsel %vm858_vm4, %v7906_v58, -inf }
 0x445   :  { %2229 = vmax.xlane.f32.xlu0 %v2228_v60 }
 0x44a   :  { %7136 = vrot.lane.b32.xlu1 %v7616_v36, %s7469_s15 }
 0x44e   :  { %7146 = vrot.lane.b32.xlu1 %v7647_v57, %s7469_s15 }
 0x452   :  { %7151 = vrot.lane.b32.xlu1 %v7660_v63, %s7469_s15 }
 0x456   :  { %7156 = vrot.lane.b32.xlu1 %v7666_v5, %s7469_s15 }
 0x45a   :  { %7166 = vrot.lane.b32.xlu1 %v7622_v40, %s7469_s15 }
 0x45b   :  { %7141 = vrot.lane.b32.xlu0 %v7637_v49, %s7469_s15 }
 0x45e   :  { %7176 = vrot.lane.b32.xlu1 %v7616_v36, %s7470_s16 }
 0x45f   :  { %7161 = vrot.lane.b32.xlu0 %v7682_v11, %s7469_s15 }
 0x463   :  { %7171 = vrot.lane.b32.xlu0 %v7641_v52, %s7469_s15 }
 0x4ae   :  { %v2209_v39 = vpop.xlane.xlu1 %2208 }
 0x4af   :  { %v2231_v61 = vsub.f32 %v1657_v25, %v2209_v39 }
 0x4b1   :  { %v2239_v0 = vmul.f32 1.442695, %v2231_v61 }
 0x4b3   :  { %7367 = vpow2.f32 %v2239_v0 }
 0x4b6   :  { %v2215_v1 = vpop.xlane.xlu0 %2214 }
 0x4b7   :  { %v2233_v2 = vsub.f32 %v1813_v31, %v2215_v1 }
 0x4b9   :  { %v2243_v59 = vmul.f32 1.442695, %v2233_v2 }
 0x4ba   :  { %v2212_v3 = vpop.xlane.xlu0 %2211 }
 0x4bb   :  { %7369 = vpow2.f32 %v2243_v59  ;;  %v2232_v4 = vsub.f32 %v1735_v34, %v2212_v3 }
 0x4bd   :  { %v7920_v6 = vpop.eup %7367  ;;  %v2241_v7 = vmul.f32 1.442695, %v2232_v4 }
 0x4be   :  { %v2221_v8 = vpop.xlane.xlu1 %2220  ;;  %v2255_v9 = vsel %vm858_vm4, %v7920_v6, 0.0 }
 0x4bf   :  { %7371 = vpow2.f32 %v2241_v7  ;;  %v2235_v12 = vsub.f32 %v1969_v35, %v2221_v8  ;;  %2256 = vadd.xlane.f32.xlu1 %v2255_v9 }
 0x4c1   :  { %v2247_v13 = vmul.f32 1.442695, %v2235_v12 }
 0x4c2   :  { %v2218_v15 = vpop.xlane.xlu0 %2217 }
 0x4c3   :  { %7373 = vpow2.f32 %v2247_v13  ;;  %v2234_v17 = vsub.f32 %v1891_v44, %v2218_v15 }
 0x4c5   :  { %v7924_v18 = vpop.eup %7369  ;;  %v2245_v20 = vmul.f32 1.442695, %v2234_v17 }
 0x4c6   :  { %v2227_v24 = vpop.xlane.xlu1 %2226  ;;  %v2261_v25 = vsel %vm858_vm4, %v7924_v18, 0.0 }
 0x4c7   :  { %7375 = vpow2.f32 %v2245_v20  ;;  %v2237_v27 = vsub.f32 %v2125_v47, %v2227_v24  ;;  %2262 = vadd.xlane.f32.xlu1 %v2261_v25 }
 0x4c9   :  { %v7928_v28 = vpop.eup %7371  ;;  %v2251_v30 = vmul.f32 1.442695, %v2237_v27 }
 0x4ca   :  { %v7137_v31 = vpop.permute.xlu1 %7136  ;;  %v2224_v32 = vpop.xlane.xlu0 %2223  ;;  %v2258_v26 = vsel %vm858_vm4, %v7928_v28, 0.0 }
 0x4cb   :  { %7377 = vpow2.f32 %v2251_v30  ;;  %v7139_v34 = vunpack.i.h.bf16 %v7137_v31  ;;  %v7138_v38 = vunpack.i.l.bf16 %v7137_v31  ;;  %v2236_v41 = vsub.f32 %v2047_v53, %v2224_v32  ;;  %2259 = vadd.xlane.f32.xlu0 %v2258_v26 }
 0x4cd   :  { %v7932_v35 = vpop.eup %7373  ;;  %v6895_v42 = vpack.c.bf16 %v7139_v34, %v7138_v38  ;;  %v2249_v43 = vmul.f32 1.442695, %v2236_v41 }
 0x4ce   :  { %v2267_v44 = vsel %vm858_vm4, %v7932_v35, 0.0  ;;  %v7147_v2 = vpop.permute.xlu1 %7146 }
 0x4cf   :  { %7379 = vpow2.f32 %v2249_v43  ;;  %2268 = vadd.xlane.f32.xlu1 %v2267_v44  ;;  %6896 = vmatpush3.bf16.msra.mxu0 %v6895_v42  ;;  %v7149_v15 = vunpack.i.h.bf16 %v7147_v2  ;;  %v7148_v17 = vunpack.i.l.bf16 %v7147_v2 }
 0x4d0   :  { %6900 = vmatprep.subr.bf16.mxu0 %v7464_v22 }
 0x4d1   :  { %v7937_v37 = vpop.eup %7375  ;;  %v6901_v27 = vpack.c.bf16 %v7149_v15, %v7148_v17 }
 0x4d2   :  { %v2230_v45 = vpop.xlane.xlu0 %2229  ;;  %v2264_v47 = vsel %vm858_vm4, %v7937_v37, 0.0  ;;  %v7152_v59 = vpop.permute.xlu1 %7151 }
 0x4d3   :  { %v2238_v48 = vsub.f32 %v7906_v58, %v2230_v45  ;;  %2265 = vadd.xlane.f32.xlu0 %v2264_v47  ;;  %v7153_v41 = vunpack.i.l.bf16 %v7152_v59 }
 0x4d5   :  { %v7942_v50 = vpop.eup %7377  ;;  %v2253_v53 = vmul.f32 1.442695, %v2238_v48 }
 0x4d6   :  { %v7142_v54 = vpop.permute.xlu0 %7141  ;;  %v2273_v56 = vsel %vm858_vm4, %v7942_v50, 0.0  ;;  %v7157_v3 = vpop.permute.xlu1 %7156 }
 0x4d7   :  { %7381 = vpow2.f32 %v2253_v53  ;;  %v7144_v55 = vunpack.i.h.bf16 %v7142_v54  ;;  %2274 = vadd.xlane.f32.xlu1 %v2273_v56  ;;  %v7143_v60 = vunpack.i.l.bf16 %v7142_v54  ;;  %v7159_v31 = vunpack.i.h.bf16 %v7157_v3 }
 0x4d8   :  { %v7158_v32 = vunpack.i.l.bf16 %v7157_v3 }
 0x4d9   :  { %v7946_v39 = vpop.eup %7379  ;;  %v6898_v61 = vpack.c.bf16 %v7144_v55, %v7143_v60 }
 0x4da   :  { %v2270_v0 = vsel %vm858_vm4, %v7946_v39, 0.0  ;;  %v7167_v4 = vpop.permute.xlu1 %7166  ;;  %v7162_v9 = vpop.permute.xlu0 %7161  ;;  %v6907_v42 = vpack.c.bf16 %v7159_v31, %v7158_v32 }
 0x4db   :  { %2271 = vadd.xlane.f32.xlu0 %v2270_v0  ;;  %6899 = vmatpush3.bf16.msra.mxu1 %v6898_v61  ;;  %v7169_v48 = vunpack.i.h.bf16 %v7167_v4  ;;  %v7164_v55 = vunpack.i.h.bf16 %v7162_v9  ;;  %v7163_v60 = vunpack.i.l.bf16 %v7162_v9 }
 0x4dc   :  { %6903 = vmatprep.subr.bf16.mxu1 %v7464_v22 }
 0x4de   :  { %v7983_v7 = vpop.permute.xlu1 %7176  ;;  %v7985_v12 = vpop.permute.xlu0 %7171 }
 0x4df   :  { %v7178_v2 = vunpack.i.l.bf16 %v7983_v7 }
 0x4e1   :  { %v7951_v58 = vpop.eup %7381 }
 0x4e2   :  { %v2276_v1 = vsel %vm858_vm4, %v7951_v58, 0.0 }
 0x4e3   :  { %2277 = vadd.xlane.f32.xlu0 %v2276_v1  ;;  %v6910_v1 = vpack.c.bf16 %v7164_v55, %v7163_v60 }
 0x4e8   :  { %7186 = vrot.lane.b32.xlu1 %v7647_v57, %s7470_s16 }
 0x4ec   :  { %2927 = vrot.lane.b32.xlu1 %v7633_v46, %s7470_s16 }
 0x4f0   :  { %7201 = vrot.lane.b32.xlu1 %v7682_v11, %s7470_s16 }
 0x4f4   :  { %7211 = vrot.lane.b32.xlu1 %v7641_v52, %s7470_s16 }
 0x4f8   :  { %7221 = vrot.lane.b32.xlu1 %v7637_v49, %s7471_s17 }
 0x4f9   :  { %7181 = vrot.lane.b32.xlu0 %v7637_v49, %s7470_s16 }
 0x4fc   :  { %7226 = vrot.lane.b32.xlu1 %v7647_v57, %s7471_s17 }
 0x4fd   :  { %7191 = vrot.lane.b32.xlu0 %v7660_v63, %s7470_s16 }
 0x500   :  { %7231 = vrot.lane.b32.xlu1 %v7660_v63, %s7471_s17 }
 0x501   :  { %7196 = vrot.lane.b32.xlu0 %v7666_v5, %s7470_s16 }
 0x504   :  { %7241 = vrot.lane.b32.xlu1 %v7682_v11, %s7471_s17 }
 0x505   :  { %7206 = vrot.lane.b32.xlu0 %v7622_v40, %s7470_s16 }
 0x509   :  { %7216 = vrot.lane.b32.xlu0 %v7616_v36, %s7471_s17 }
 0x50d   :  { %7236 = vrot.lane.b32.xlu0 %v7666_v5, %s7471_s17 }
 0x54c   :  { %v2257_v8 = vpop.xlane.xlu1 %2256 }
 0x54d   :  { %7383 = vrcp.f32 %v2257_v8  ;;  %v7173_v8 = vunpack.i.l.bf16 %v7985_v12 }
 0x554   :  { %v2263_v13 = vpop.xlane.xlu1 %2262 }
 0x555   :  { %7385 = vrcp.f32 %v2263_v13 }
 0x557   :  { %v7384_v20 = vpop.eup %7383 }
 0x558   :  { %v2287_v24 = vmul.f32 %v7384_v20, %v7920_v6  ;;  %v2260_v25 = vpop.xlane.xlu0 %2259  ;;  %v7154_v6 = vunpack.i.h.bf16 %v7152_v59 }
 0x559   :  { %7387 = vrcp.f32 %v2260_v25 }
 0x55a   :  { %6503 = vmatmul.mubr.msk.f32.vlgmr.msra.gmra.mrb[32].mxu0 %vm858_vm4, %v2287_v24  ;;  %v6904_v47 = vpack.c.bf16 %v7154_v6, %v7153_v41 }
 0x55b   :  { %6902 = vmatpush3.bf16.msra.mxu0 %v6901_v27  ;;  %6516 = vmatprep.mubr.msk.f32.mxu0 %vm7465_vm1, %v7466_v23 }
 0x55c   :  { %v2269_v30 = vpop.xlane.xlu1 %2268  ;;  %6906 = vmatprep.subr.bf16.mxu0 %v7464_v22 }
 0x55d   :  { %7389 = vrcp.f32 %v2269_v30 }
 0x55f   :  { %v7386_v26 = vpop.eup %7385 }
 0x560   :  { %v2289_v34 = vmul.f32 %v7386_v26, %v7924_v18  ;;  %v2266_v38 = vpop.xlane.xlu0 %2265  ;;  %v7168_v18 = vunpack.i.l.bf16 %v7167_v4 }
 0x561   :  { %7391 = vrcp.f32 %v2266_v38 }
 0x562   :  { %6517 = vmatmul.mubr.msk.f32.vlgmr.msra.gmra.mrb[34].mxu0 %vm858_vm4, %v2289_v34 }
 0x563   :  { %v7388_v43 = vpop.eup %7387  ;;  %6908 = vmatpush3.bf16.msra.mxu0 %v6907_v42  ;;  %6530 = vmatprep.mubr.msk.f32.mxu0 %vm7465_vm1, %v7466_v23 }
 0x564   :  { %v2288_v44 = vmul.f32 %v7388_v43, %v7928_v28  ;;  %v2275_v45 = vpop.xlane.xlu1 %2274  ;;  %6912 = vmatprep.subr.bf16.mxu0 %v7464_v22  ;;  %v6913_v28 = vpack.c.bf16 %v7169_v48, %v7168_v18 }
 0x565   :  { %7393 = vrcp.f32 %v2275_v45 }
 0x566   :  { %6510 = vmatmul.mubr.msk.f32.vlgmr.msra.gmra.mrb[32].mxu1 %vm858_vm4, %v2288_v44 }
 0x567   :  { %v7390_v53 = vpop.eup %7389  ;;  %6905 = vmatpush3.bf16.msra.mxu1 %v6904_v47  ;;  %6523 = vmatprep.mubr.msk.f32.mxu1 %vm7465_vm1, %v7466_v23 }
 0x568   :  { %v2291_v54 = vmul.f32 %v7390_v53, %v7932_v35  ;;  %v2272_v56 = vpop.xlane.xlu0 %2271  ;;  %6909 = vmatprep.subr.bf16.mxu1 %v7464_v22  ;;  %v7179_v35 = vunpack.i.h.bf16 %v7983_v7  ;;  %v7187_v13 = vpop.permute.xlu1 %7186 }
 0x569   :  { %7395 = vrcp.f32 %v2272_v56  ;;  %v7189_v20 = vunpack.i.h.bf16 %v7187_v13 }
 0x56a   :  { %6531 = vmatmul.mubr.msk.f32.vlgmr.msra.gmra.mrb[36].mxu0 %vm858_vm4, %v2291_v54  ;;  %v6919_v9 = vpack.c.bf16 %v7179_v35, %v7178_v2 }
 0x56b   :  { %v7392_v61 = vpop.eup %7391  ;;  %6914 = vmatpush3.bf16.msra.mxu0 %v6913_v28  ;;  %6544 = vmatprep.mubr.msk.f32.mxu0 %vm7465_vm1, %v7466_v23 }
 0x56c   :  { %v2290_v0 = vmul.f32 %v7392_v61, %v7937_v37  ;;  %6918 = vmatprep.subr.bf16.mxu0 %v7464_v22  ;;  %v7174_v37 = vunpack.i.h.bf16 %v7985_v12  ;;  %v7188_v12 = vunpack.i.l.bf16 %v7187_v13 }
 0x56e   :  { %6524 = vmatmul.mubr.msk.f32.vlgmr.msra.gmra.mrb[34].mxu1 %vm858_vm4, %v2290_v0  ;;  %v6916_v17 = vpack.c.bf16 %v7174_v37, %v7173_v8  ;;  %v6927_v25 = vpack.c.bf16 %v7189_v20, %v7188_v12 }
 0x56f   :  { %v7394_v59 = vpop.eup %7393  ;;  %6911 = vmatpush3.bf16.msra.mxu1 %v6910_v1  ;;  %6537 = vmatprep.mubr.msk.f32.mxu1 %vm7465_vm1, %v7466_v23 }
 0x570   :  { %v2293_v3 = vmul.f32 %v7394_v59, %v7942_v50  ;;  %v2278_v4 = vpop.xlane.xlu0 %2277  ;;  %6915 = vmatprep.subr.bf16.mxu1 %v7464_v22 }
 0x571   :  { %7397 = vrcp.f32 %v2278_v4 }
 0x572   :  { %6545 = vmatmul.mubr.msk.f32.vlgmr.msra.gmra.mrb[38].mxu0 %vm858_vm4, %v2293_v3 }
 0x573   :  { %v7396_v7 = vpop.eup %7395  ;;  %6558 = vmatprep.mubr.msk.f32.mxu0 %vm7465_vm1, %v7466_v23 }
 0x574   :  { %v2292_v15 = vmul.f32 %v7396_v7, %v7946_v39  ;;  %6921 = vmatpush3.bf16.xpose.msk.msra.mxu0 %vm7609_vm3, %v6919_v9  ;;  %v7182_v50 = vpop.permute.xlu0 %7181  ;;  %v8028_v39 = vpop.permute.xlu1 %2927 }
 0x575   :  { %6926 = vmatprep.subr.bf16.mxu0 %v7464_v22  ;;  %v7184_v27 = vunpack.i.h.bf16 %v7182_v50  ;;  %v7183_v30 = vunpack.i.l.bf16 %v7182_v50 }
 0x576   :  { %6538 = vmatmul.mubr.msk.f32.vlgmr.msra.gmra.mrb[36].mxu1 %vm858_vm4, %v2292_v15 }
 0x577   :  { %6917 = vmatpush3.bf16.msra.mxu1 %v6916_v17  ;;  %6551 = vmatprep.mubr.msk.f32.mxu1 %vm7465_vm1, %v7466_v23  ;;  %v6923_v34 = vpack.c.bf16 %v7184_v27, %v7183_v30 }
 0x578   :  { %v7192_v24 = vpop.permute.xlu0 %7191  ;;  %6922 = vmatprep.subr.bf16.mxu1 %v7464_v22  ;;  %v7202_v48 = vpop.permute.xlu1 %7201 }
 0x579   :  { %v7193_v41 = vunpack.i.l.bf16 %v7192_v24  ;;  %v7204_v18 = vunpack.i.h.bf16 %v7202_v48  ;;  %v7203_v53 = vunpack.i.l.bf16 %v7202_v48 }
 0x57b   :  { %v7398_v31 = vpop.eup %7397  ;;  %6559 = vmatmul.mubr.msk.f32.vlgmr.msra.gmra.mrb[40].mxu0 %vm246_vm2, %v8028_v39  ;;  %v6939_v28 = vpack.c.bf16 %v7204_v18, %v7203_v53 }
 0x57c   :  { %v2294_v32 = vmul.f32 %v7398_v31, %v7951_v58  ;;  %6929 = vmatpush3.bf16.xpose.msk.msra.mxu0 %vm7609_vm3, %v6927_v25  ;;  %v7197_v26 = vpop.permute.xlu0 %7196  ;;  %6572 = vmatprep.mubr.msk.f32.mxu0 %vm7465_vm1, %v7466_v23  ;;  %v7194_v58 = vunpack.i.h.bf16 %v7192_v24  ;;  %v7212_v61 = vpop.permute.xlu1 %7211 }
 0x57d   :  { %6934 = vmatprep.subr.bf16.mxu0 %v7464_v22  ;;  %v7199_v38 = vunpack.i.h.bf16 %v7197_v26  ;;  %v7198_v6 = vunpack.i.l.bf16 %v7197_v26  ;;  %v7214_v0 = vunpack.i.h.bf16 %v7212_v61  ;;  %v7213_v1 = vunpack.i.l.bf16 %v7212_v61 }
 0x57e   :  { %6552 = vmatmul.mubr.msk.f32.vlgmr.msra.gmra.mrb[38].mxu1 %vm858_vm4, %v2294_v32  ;;  %v6931_v44 = vpack.c.bf16 %v7194_v58, %v7193_v41 }
 0x57f   :  { %6565 = vmatprep.mubr.msk.f32.mxu1 %vm7465_vm1, %v7466_v23  ;;  %v6935_v42 = vpack.c.bf16 %v7199_v38, %v7198_v6  ;;  %v6947_v2 = vpack.c.bf16 %v7214_v0, %v7213_v1 }
 0x580   :  { %6925 = vmatpush3.bf16.xpose.msk.msra.mxu1 %vm7609_vm3, %v6923_v34  ;;  %v7207_v43 = vpop.permute.xlu0 %7206  ;;  %v7222_v59 = vpop.permute.xlu1 %7221 }
 0x581   :  { %6930 = vmatprep.subr.bf16.mxu1 %v7464_v22  ;;  %v7209_v45 = vunpack.i.h.bf16 %v7207_v43  ;;  %v7208_v47 = vunpack.i.l.bf16 %v7207_v43  ;;  %v7224_v3 = vunpack.i.h.bf16 %v7222_v59  ;;  %v7223_v4 = vunpack.i.l.bf16 %v7222_v59 }
 0x583   :  { %6573 = vmatmul.mubr.msk.f32.vlgmr.msra.gmra.mrb[42].mxu0 %vm246_vm2, %v8028_v39  ;;  %v6943_v54 = vpack.c.bf16 %v7209_v45, %v7208_v47  ;;  %v6954_v37 = vpack.c.bf16 %v7224_v3, %v7223_v4 }
 0x584   :  { %6937 = vmatpush3.bf16.xpose.msk.msra.mxu0 %vm7609_vm3, %v6935_v42  ;;  %6586 = vmatprep.mubr.msk.f32.mxu0 %vm7465_vm1, %v7466_v23  ;;  %v7217_v56 = vpop.permute.xlu0 %7216  ;;  %v8120_v59 = vpop.permute.xlu1 %7226 }
 0x585   :  { %6942 = vmatprep.subr.bf16.mxu0 %v7464_v22  ;;  %v7219_v55 = vunpack.i.h.bf16 %v7217_v56  ;;  %v7218_v60 = vunpack.i.l.bf16 %v7217_v56 }
 0x587   :  { %6566 = vmatmul.mubr.msk.f32.vlgmr.msra.gmra.mrb[40].mxu1 %vm246_vm2, %v8028_v39  ;;  %v6951_v35 = vpack.c.bf16 %v7219_v55, %v7218_v60 }
 0x588   :  { %6933 = vmatpush3.bf16.xpose.msk.msra.mxu1 %vm7609_vm3, %v6931_v44  ;;  %6579 = vmatprep.mubr.msk.f32.mxu1 %vm7465_vm1, %v7466_v23  ;;  %v8122_v3 = vpop.permute.xlu0 %7236 }
 0x589   :  { %6938 = vmatprep.subr.bf16.mxu1 %v7464_v22 }
 0x58b   :  { %6587 = vmatmul.mubr.msk.f32.vlgmr.msra.gmra.mrb[44].mxu0 %vm246_vm2, %v8028_v39 }
 0x58c   :  { %6945 = vmatpush3.bf16.xpose.msk.msra.mxu0 %vm7609_vm3, %v6943_v54  ;;  %6600 = vmatprep.mubr.msk.f32.mxu0 %vm7465_vm1, %v7466_v23 }
 0x58d   :  { %6950 = vmatprep.subr.bf16.mxu0 %v7464_v22 }
 0x58f   :  { %6580 = vmatmul.mubr.msk.f32.vlgmr.msra.gmra.mrb[42].mxu1 %vm246_vm2, %v8028_v39 }
 0x590   :  { %6941 = vmatpush3.bf16.xpose.msk.msra.mxu1 %vm7609_vm3, %v6939_v28  ;;  %6593 = vmatprep.mubr.msk.f32.mxu1 %vm7465_vm1, %v7466_v23 }
 0x591   :  { %6946 = vmatprep.subr.bf16.mxu1 %v7464_v22 }
 0x593   :  { %6601 = vmatmul.mubr.msk.f32.vlgmr.msra.gmra.mrb[46].mxu0 %vm246_vm2, %v8028_v39 }
 0x594   :  { %6952 = vmatpush3.bf16.msra.mxu0 %v6951_v35  ;;  %6614 = vmatprep.mubr.msk.f32.mxu0 %vm7465_vm1, %v7466_v23 }
 0x595   :  { %6956 = vmatprep.subr.bf16.mxu0 %v7464_v22 }
 0x597   :  { %6594 = vmatmul.mubr.msk.f32.vlgmr.msra.gmra.mrb[44].mxu1 %vm246_vm2, %v8028_v39 }
 0x598   :  { %6949 = vmatpush3.bf16.xpose.msk.msra.mxu1 %vm7609_vm3, %v6947_v2  ;;  %6607 = vmatprep.mubr.msk.f32.mxu1 %vm7465_vm1, %v7466_v23 }
 0x599   :  { %6953 = vmatprep.subr.bf16.mxu1 %v7464_v22 }
 0x59f   :  { %6608 = vmatmul.mubr.msk.f32.vlgmr.msra.gmra.mrb[46].mxu1 %vm246_vm2, %v8028_v39 }
 0x5a0   :  { %6955 = vmatpush3.bf16.msra.mxu1 %v6954_v37  ;;  %6621 = vmatprep.mubr.msk.f32.mxu1 %vm7465_vm1, %v7466_v23 }
 0x5a1   :  { %6959 = vmatprep.subr.bf16.mxu1 %v7464_v22 }
 0x62d   :  { %v8089_v8 = vpop.f32.mrb[32].mxu0 }
 0x62e   :  { %v6504_v9 = vpop.f32.mrb[33].mxu0 }
 0x62f   :  { %v8124_v9 = vpop.permute.xlu1 %7231 }
 0x635   :  { %v8091_v7 = vpop.f32.mrb[34].mxu0 }
 0x636   :  { %v6518_v13 = vpop.f32.mrb[35].mxu0 }
 0x639   :  { %v8093_v15 = vpop.f32.mrb[32].mxu1 }
 0x63a   :  { %v6511_v50 = vpop.f32.mrb[33].mxu1 }
 0x63b   :  { %v8126_v50 = vpop.permute.xlu1 %7241 }
 0x63d   :  { %v8095_v17 = vpop.f32.mrb[36].mxu0 }
 0x63e   :  { %v6532_v20 = vpop.f32.mrb[37].mxu0 }
 0x641   :  { %v8097_v12 = vpop.f32.mrb[34].mxu1 }
 0x642   :  { %v6525_v24 = vpop.f32.mrb[35].mxu1 }
 0x645   :  { %v8099_v25 = vpop.f32.mrb[38].mxu0 }
 0x646   :  { %v6546_v39 = vpop.f32.mrb[39].mxu0 }
 0x649   :  { %v8101_v27 = vpop.f32.mrb[36].mxu1 }
 0x64a   :  { %v6539_v30 = vpop.f32.mrb[37].mxu1 }
 0x64e   :  { %v3005_v31 = vpop.f32.mrb[40].mxu0 }
 0x64f   :  { %v3555_v32 = vsel %vm858_vm4, %v3005_v31, -inf  ;;  %v6560_v26 = vpop.f32.mrb[41].mxu0 }
 0x650   :  { %3556 = vmax.xlane.f32.xlu0 %v3555_v32 }
 0x651   :  { %v8104_v34 = vpop.f32.mrb[38].mxu1 }
 0x652   :  { %v6553_v38 = vpop.f32.mrb[39].mxu1 }
 0x656   :  { %v3161_v6 = vpop.f32.mrb[42].mxu0 }
 0x657   :  { %v3561_v58 = vsel %vm858_vm4, %v3161_v6, -inf  ;;  %v6574_v41 = vpop.f32.mrb[43].mxu0 }
 0x658   :  { %3562 = vmax.xlane.f32.xlu0 %v3561_v58 }
 0x65a   :  { %v3083_v42 = vpop.f32.mrb[40].mxu1 }
 0x65b   :  { %v3558_v43 = vsel %vm858_vm4, %v3083_v42, -inf  ;;  %v6567_v44 = vpop.f32.mrb[41].mxu1 }
 0x65c   :  { %3559 = vmax.xlane.f32.xlu1 %v3558_v43 }
 0x65e   :  { %v3317_v45 = vpop.f32.mrb[44].mxu0 }
 0x65f   :  { %v6588_v47 = vpop.f32.mrb[45].mxu0  ;;  %v3567_v48 = vsel %vm858_vm4, %v3317_v45, -inf }
 0x660   :  { %3568 = vmax.xlane.f32.xlu0 %v3567_v48 }
 0x662   :  { %v3239_v18 = vpop.f32.mrb[42].mxu1 }
 0x663   :  { %v6581_v53 = vpop.f32.mrb[43].mxu1  ;;  %v3564_v54 = vsel %vm858_vm4, %v3239_v18, -inf }
 0x664   :  { %3565 = vmax.xlane.f32.xlu0 %v3564_v54 }
 0x666   :  { %v8110_v56 = vpop.f32.mrb[46].mxu0 }
 0x667   :  { %v6602_v28 = vpop.f32.mrb[47].mxu0  ;;  %v3573_v55 = vsel %vm858_vm4, %v8110_v56, -inf }
 0x668   :  { %3574 = vmax.xlane.f32.xlu0 %v3573_v55 }
 0x66a   :  { %v3395_v60 = vpop.f32.mrb[44].mxu1 }
 0x66b   :  { %v6595_v61 = vpop.f32.mrb[45].mxu1  ;;  %v3570_v0 = vsel %vm858_vm4, %v3395_v60, -inf }
 0x66c   :  { %3571 = vmax.xlane.f32.xlu1 %v3570_v0 }
 0x672   :  { %v3551_v1 = vpop.f32.mrb[46].mxu1 }
 0x673   :  { %v6609_v35 = vpop.f32.mrb[47].mxu1  ;;  %v3576_v2 = vsel %vm858_vm4, %v3551_v1, -inf }
 0x674   :  { %3577 = vmax.xlane.f32.xlu1 %v3576_v2 }
 0x67e   :  { %7246 = vrot.lane.b32.xlu0 %v7622_v40, %s7471_s17 }
 0x685   :  { %7251 = vrot.lane.b32.xlu1 %v7641_v52, %s7471_s17 }
 0x6dd   :  { %v3557_v4 = vpop.xlane.xlu0 %3556 }
 0x6de   :  { %v3579_v37 = vsub.f32 %v3005_v31, %v3557_v4 }
 0x6e0   :  { %v3587_v13 = vmul.f32 1.442695, %v3579_v37 }
 0x6e2   :  { %7399 = vpow2.f32 %v3587_v13 }
 0x6e5   :  { %v3563_v20 = vpop.xlane.xlu0 %3562 }
 0x6e6   :  { %v3581_v24 = vsub.f32 %v3161_v6, %v3563_v20 }
 0x6e8   :  { %v3591_v39 = vmul.f32 1.442695, %v3581_v24 }
 0x6e9   :  { %v3560_v30 = vpop.xlane.xlu1 %3559 }
 0x6ea   :  { %7401 = vpow2.f32 %v3591_v39  ;;  %v3580_v32 = vsub.f32 %v3083_v42, %v3560_v30 }
 0x6ec   :  { %v8128_v26 = vpop.eup %7399  ;;  %v3589_v38 = vmul.f32 1.442695, %v3580_v32 }
 0x6ed   :  { %v3569_v58 = vpop.xlane.xlu0 %3568  ;;  %v3603_v41 = vsel %vm858_vm4, %v8128_v26, 0.0 }
 0x6ee   :  { %7403 = vpow2.f32 %v3589_v38  ;;  %v3583_v31 = vsub.f32 %v3317_v45, %v3569_v58  ;;  %3604 = vadd.xlane.f32.xlu0 %v3603_v41 }
 0x6f0   :  { %v3595_v43 = vmul.f32 1.442695, %v3583_v31 }
 0x6f1   :  { %v3566_v44 = vpop.xlane.xlu0 %3565 }
 0x6f2   :  { %7405 = vpow2.f32 %v3595_v43  ;;  %v3582_v47 = vsub.f32 %v3239_v18, %v3566_v44  ;;  %v7229_v43 = vunpack.i.h.bf16 %v8120_v59  ;;  %v7228_v44 = vunpack.i.l.bf16 %v8120_v59 }
 0x6f3   :  { %v7238_v59 = vunpack.i.l.bf16 %v8122_v3 }
 0x6f4   :  { %v8132_v48 = vpop.eup %7401  ;;  %v3593_v6 = vmul.f32 1.442695, %v3582_v47 }
 0x6f5   :  { %v3609_v42 = vsel %vm858_vm4, %v8132_v48, 0.0  ;;  %v3575_v4 = vpop.xlane.xlu0 %3574 }
 0x6f6   :  { %7407 = vpow2.f32 %v3593_v6  ;;  %3610 = vadd.xlane.f32.xlu0 %v3609_v42  ;;  %v3585_v37 = vsub.f32 %v8110_v56, %v3575_v4  ;;  %v6957_v42 = vpack.c.bf16 %v7229_v43, %v7228_v44 }
 0x6f8   :  { %v8136_v53 = vpop.eup %7403  ;;  %v3599_v13 = vmul.f32 1.442695, %v3585_v37 }
 0x6f9   :  { %v3572_v54 = vpop.xlane.xlu1 %3571  ;;  %v3606_v28 = vsel %vm858_vm4, %v8136_v53, 0.0  ;;  %v7247_v56 = vpop.permute.xlu0 %7246 }
 0x6fa   :  { %v3584_v45 = vsub.f32 %v3395_v60, %v3572_v54  ;;  %3607 = vadd.xlane.f32.xlu1 %v3606_v28  ;;  %v7239_v28 = vunpack.i.h.bf16 %v8122_v3 }
 0x6fc   :  { %v8140_v55 = vpop.eup %7405  ;;  %v3597_v61 = vmul.f32 1.442695, %v3584_v45 }
 0x6fd   :  { %v3615_v18 = vsel %vm858_vm4, %v8140_v55, 0.0 }
 0x6fe   :  { %7409 = vpow2.f32 %v3597_v61  ;;  %3616 = vadd.xlane.f32.xlu0 %v3615_v18  ;;  %v7234_v18 = vunpack.i.h.bf16 %v8124_v9 }
 0x6ff   :  { %7411 = vpow2.f32 %v3599_v13  ;;  %v7248_v13 = vunpack.i.l.bf16 %v7247_v56 }
 0x700   :  { %v8144_v0 = vpop.eup %7407 }
 0x701   :  { %v3612_v35 = vsel %vm858_vm4, %v8144_v0, 0.0  ;;  %v3578_v20 = vpop.xlane.xlu1 %3577 }
 0x702   :  { %3613 = vadd.xlane.f32.xlu1 %v3612_v35  ;;  %v3586_v24 = vsub.f32 %v3551_v1, %v3578_v20  ;;  %v7233_v35 = vunpack.i.l.bf16 %v8124_v9 }
 0x704   :  { %v3601_v39 = vmul.f32 1.442695, %v3586_v24  ;;  %v6960_v37 = vpack.c.bf16 %v7234_v18, %v7233_v35 }
 0x705   :  { %v7252_v41 = vpop.permute.xlu1 %7251 }
 0x706   :  { %7413 = vpow2.f32 %v3601_v39  ;;  %v7244_v39 = vunpack.i.h.bf16 %v8126_v50 }
 0x708   :  { %v8148_v2 = vpop.eup %7409 }
 0x709   :  { %v3618_v60 = vsel %vm858_vm4, %v8148_v2, 0.0  ;;  %v8155_v30 = vpop.eup %7411 }
 0x70a   :  { %3619 = vadd.xlane.f32.xlu1 %v3618_v60  ;;  %v3621_v32 = vsel %vm858_vm4, %v8155_v30, 0.0  ;;  %v6963_v60 = vpack.c.bf16 %v7239_v28, %v7238_v59 }
 0x710   :  { %v8159_v38 = vpop.eup %7413 }
 0x711   :  { %v3624_v58 = vsel %vm858_vm4, %v8159_v38, 0.0 }
 0x714   :  { %7256 = vrot.lane.b32.xlu0 %v7616_v36, %s7472_s18 }
 0x71b   :  { %7261 = vrot.lane.b32.xlu1 %v7637_v49, %s7472_s18 }
 0x733   :  { %3622 = vadd.xlane.f32.xlu0 %v3621_v32 }
 0x73f   :  { %3625 = vadd.xlane.f32.xlu1 %v3624_v58 }
 0x749   :  { %7266 = vrot.lane.b32.xlu0 %v7647_v57, %s7472_s18 }
 0x74d   :  { %4275 = vrot.lane.b32.xlu0 %v7633_v46, %s7472_s18 }
 0x750   :  { %7271 = vrot.lane.b32.xlu1 %v7660_v63, %s7472_s18 }
 0x751   :  { %7281 = vrot.lane.b32.xlu0 %v7682_v11, %s7472_s18 }
 0x754   :  { %7276 = vrot.lane.b32.xlu1 %v7666_v5, %s7472_s18 }
 0x755   :  { %7291 = vrot.lane.b32.xlu0 %v7641_v52, %s7472_s18 }
 0x758   :  { %7286 = vrot.lane.b32.xlu1 %v7622_v40, %s7472_s18 }
 0x77b   :  { %v3605_v1 = vpop.xlane.xlu0 %3604 }
 0x77c   :  { %7415 = vrcp.f32 %v3605_v1  ;;  %v7253_v1 = vunpack.i.l.bf16 %v7252_v41 }
 0x783   :  { %v3611_v31 = vpop.xlane.xlu0 %3610 }
 0x784   :  { %7417 = vrcp.f32 %v3611_v31 }
 0x786   :  { %v7416_v46 = vpop.eup %7415 }
 0x787   :  { %v3635_v47 = vmul.f32 %v7416_v46, %v8128_v26  ;;  %v3608_v6 = vpop.xlane.xlu1 %3607 }
 0x788   :  { %7419 = vrcp.f32 %v3608_v6 }
 0x789   :  { %6615 = vmatmul.mubr.msk.f32.vlgmr.msra.gmra.mrb[48].mxu0 %vm858_vm4, %v3635_v47 }
 0x78a   :  { %6958 = vmatpush3.bf16.msra.mxu0 %v6957_v42  ;;  %6628 = vmatprep.mubr.msk.f32.mxu0 %vm7465_vm1, %v7466_v23 }
 0x78b   :  { %v3617_v54 = vpop.xlane.xlu0 %3616  ;;  %6962 = vmatprep.subr.bf16.mxu0 %v7464_v22 }
 0x78c   :  { %7421 = vrcp.f32 %v3617_v54 }
 0x78e   :  { %v7418_v45 = vpop.eup %7417 }
 0x78f   :  { %v3637_v26 = vmul.f32 %v7418_v45, %v8132_v48  ;;  %v3614_v61 = vpop.xlane.xlu1 %3613  ;;  %v7249_v48 = vunpack.i.h.bf16 %v7247_v56 }
 0x790   :  { %7423 = vrcp.f32 %v3614_v61 }
 0x791   :  { %6629 = vmatmul.mubr.msk.f32.vlgmr.msra.gmra.mrb[50].mxu0 %vm858_vm4, %v3637_v26  ;;  %v6969_v32 = vpack.c.bf16 %v7249_v48, %v7248_v13 }
 0x792   :  { %v7420_v4 = vpop.eup %7419  ;;  %6964 = vmatpush3.bf16.msra.mxu0 %v6963_v60  ;;  %6642 = vmatprep.mubr.msk.f32.mxu0 %vm7465_vm1, %v7466_v23 }
 0x793   :  { %v3636_v3 = vmul.f32 %v7420_v4, %v8136_v53  ;;  %6968 = vmatprep.subr.bf16.mxu0 %v7464_v22  ;;  %v7243_v53 = vunpack.i.l.bf16 %v8126_v50  ;;  %v7254_v50 = vunpack.i.h.bf16 %v7252_v41 }
 0x795   :  { %6622 = vmatmul.mubr.msk.f32.vlgmr.msra.gmra.mrb[48].mxu1 %vm858_vm4, %v3636_v3  ;;  %v6972_v44 = vpack.c.bf16 %v7254_v50, %v7253_v1 }
 0x796   :  { %v7422_v20 = vpop.eup %7421  ;;  %6961 = vmatpush3.bf16.msra.mxu1 %v6960_v37  ;;  %6635 = vmatprep.mubr.msk.f32.mxu1 %vm7465_vm1, %v7466_v23 }
 0x797   :  { %v3639_v9 = vmul.f32 %v7422_v20, %v8140_v55  ;;  %v3620_v24 = vpop.xlane.xlu1 %3619  ;;  %6965 = vmatprep.subr.bf16.mxu1 %v7464_v22  ;;  %v6966_v55 = vpack.c.bf16 %v7244_v39, %v7243_v53 }
 0x798   :  { %7425 = vrcp.f32 %v3620_v24 }
 0x799   :  { %6643 = vmatmul.mubr.msk.f32.vlgmr.msra.gmra.mrb[52].mxu0 %vm858_vm4, %v3639_v9 }
 0x79a   :  { %v7424_v58 = vpop.eup %7423  ;;  %6970 = vmatpush3.bf16.msra.mxu0 %v6969_v32  ;;  %6656 = vmatprep.mubr.msk.f32.mxu0 %vm7465_vm1, %v7466_v23 }
 0x79b   :  { %v3638_v56 = vmul.f32 %v7424_v58, %v8144_v0  ;;  %6974 = vmatprep.subr.bf16.mxu0 %v7464_v22  ;;  %v7257_v0 = vpop.permute.xlu0 %7256  ;;  %v7262_v47 = vpop.permute.xlu1 %7261 }
 0x79c   :  { %v7259_v6 = vunpack.i.h.bf16 %v7257_v0  ;;  %v7258_v42 = vunpack.i.l.bf16 %v7257_v0  ;;  %v7264_v18 = vunpack.i.h.bf16 %v7262_v47  ;;  %v7263_v35 = vunpack.i.l.bf16 %v7262_v47 }
 0x79d   :  { %6636 = vmatmul.mubr.msk.f32.vlgmr.msra.gmra.mrb[50].mxu1 %vm858_vm4, %v3638_v56 }
 0x79e   :  { %6967 = vmatpush3.bf16.msra.mxu1 %v6966_v55  ;;  %6649 = vmatprep.mubr.msk.f32.mxu1 %vm7465_vm1, %v7466_v23  ;;  %v6979_v48 = vpack.c.bf16 %v7264_v18, %v7263_v35 }
 0x79f   :  { %6971 = vmatprep.subr.bf16.mxu1 %v7464_v22 }
 0x7a2   :  { %v7426_v31 = vpop.eup %7425 }
 0x7a3   :  { %v3640_v43 = vmul.f32 %v7426_v31, %v8148_v2  ;;  %v6975_v2 = vpack.c.bf16 %v7259_v6, %v7258_v42 }
 0x7a5   :  { %6650 = vmatmul.mubr.msk.f32.vlgmr.msra.gmra.mrb[52].mxu1 %vm858_vm4, %v3640_v43 }
 0x7a6   :  { %6973 = vmatpush3.bf16.msra.mxu1 %v6972_v44  ;;  %6663 = vmatprep.mubr.msk.f32.mxu1 %vm7465_vm1, %v7466_v23 }
 0x7a7   :  { %6978 = vmatprep.subr.bf16.mxu1 %v7464_v22 }
 0x7c0   :  { %v3623_v46 = vpop.xlane.xlu0 %3622 }
 0x7c1   :  { %7427 = vrcp.f32 %v3623_v46 }
 0x7c4   :  { %v7267_v59 = vpop.permute.xlu0 %7266 }
 0x7c5   :  { %v7269_v26 = vunpack.i.h.bf16 %v7267_v59  ;;  %v7268_v61 = vunpack.i.l.bf16 %v7267_v59 }
 0x7c8   :  { %v4276_v60 = vpop.permute.xlu0 %4275 }
 0x7cb   :  { %v7428_v54 = vpop.eup %7427 }
 0x7cc   :  { %v3641_v41 = vmul.f32 %v7428_v54, %v8155_v30  ;;  %v3626_v28 = vpop.xlane.xlu1 %3625  ;;  %v6983_v30 = vpack.c.bf16 %v7269_v26, %v7268_v61  ;;  %v7282_v56 = vpop.permute.xlu0 %7281 }
 0x7cd   :  { %7429 = vrcp.f32 %v3626_v28  ;;  %v7284_v55 = vunpack.i.h.bf16 %v7282_v56  ;;  %v7283_v50 = vunpack.i.l.bf16 %v7282_v56 }
 0x7ce   :  { %6657 = vmatmul.mubr.msk.f32.vlgmr.msra.gmra.mrb[54].mxu0 %vm858_vm4, %v3641_v41 }
 0x7cf   :  { %6977 = vmatpush3.bf16.xpose.msk.msra.mxu0 %vm7609_vm3, %v6975_v2  ;;  %6670 = vmatprep.mubr.msk.f32.mxu0 %vm7465_vm1, %v7466_v23  ;;  %v6995_v31 = vpack.c.bf16 %v7284_v55, %v7283_v50 }
 0x7d0   :  { %v7272_v45 = vpop.permute.xlu1 %7271  ;;  %6982 = vmatprep.subr.bf16.mxu0 %v7464_v22  ;;  %v7292_v43 = vpop.permute.xlu0 %7291 }
 0x7d1   :  { %v7274_v9 = vunpack.i.h.bf16 %v7272_v45  ;;  %v7273_v24 = vunpack.i.l.bf16 %v7272_v45  ;;  %v7294_v44 = vunpack.i.h.bf16 %v7292_v43  ;;  %v7293_v0 = vunpack.i.l.bf16 %v7292_v43 }
 0x7d3   :  { %v7003_v46 = vpack.c.bf16 %v7294_v44, %v7293_v0 }
 0x7d4   :  { %v7277_v4 = vpop.permute.xlu1 %7276 }
 0x7d5   :  { %v7279_v13 = vunpack.i.h.bf16 %v7277_v4  ;;  %v7278_v20 = vunpack.i.l.bf16 %v7277_v4 }
 0x7d6   :  { %6671 = vmatmul.mubr.msk.f32.vlgmr.msra.gmra.mrb[56].mxu0 %vm246_vm2, %v4276_v60 }
 0x7d7   :  { %v7430_v3 = vpop.eup %7429  ;;  %6985 = vmatpush3.bf16.xpose.msk.msra.mxu0 %vm7609_vm3, %v6983_v30  ;;  %6684 = vmatprep.mubr.msk.f32.mxu0 %vm7465_vm1, %v7466_v23  ;;  %v6991_v39 = vpack.c.bf16 %v7279_v13, %v7278_v20 }
 0x7d8   :  { %v3642_v37 = vmul.f32 %v7430_v3, %v8159_v38  ;;  %6990 = vmatprep.subr.bf16.mxu0 %v7464_v22  ;;  %v7287_v53 = vpop.permute.xlu1 %7286  ;;  %v6987_v38 = vpack.c.bf16 %v7274_v9, %v7273_v24 }
 0x7d9   :  { %v7289_v32 = vunpack.i.h.bf16 %v7287_v53  ;;  %v7288_v58 = vunpack.i.l.bf16 %v7287_v53 }
 0x7da   :  { %6664 = vmatmul.mubr.msk.f32.vlgmr.msra.gmra.mrb[54].mxu1 %vm858_vm4, %v3642_v37 }
 0x7db   :  { %6981 = vmatpush3.bf16.xpose.msk.msra.mxu1 %vm7609_vm3, %v6979_v48  ;;  %6677 = vmatprep.mubr.msk.f32.mxu1 %vm7465_vm1, %v7466_v23  ;;  %v6999_v1 = vpack.c.bf16 %v7289_v32, %v7288_v58 }
 0x7dc   :  { %6986 = vmatprep.subr.bf16.mxu1 %v7464_v22 }
 0x7de   :  { %6685 = vmatmul.mubr.msk.f32.vlgmr.msra.gmra.mrb[58].mxu0 %vm246_vm2, %v4276_v60 }
 0x7df   :  { %6993 = vmatpush3.bf16.xpose.msk.msra.mxu0 %vm7609_vm3, %v6991_v39  ;;  %6698 = vmatprep.mubr.msk.f32.mxu0 %vm7465_vm1, %v7466_v23 }
 0x7e0   :  { %6998 = vmatprep.subr.bf16.mxu0 %v7464_v22 }
 0x7e2   :  { %6678 = vmatmul.mubr.msk.f32.vlgmr.msra.gmra.mrb[56].mxu1 %vm246_vm2, %v4276_v60 }
 0x7e3   :  { %6989 = vmatpush3.bf16.xpose.msk.msra.mxu1 %vm7609_vm3, %v6987_v38  ;;  %6691 = vmatprep.mubr.msk.f32.mxu1 %vm7465_vm1, %v7466_v23 }
 0x7e4   :  { %6994 = vmatprep.subr.bf16.mxu1 %v7464_v22 }
 0x7e6   :  { %6699 = vmatmul.mubr.msk.f32.vlgmr.msra.gmra.mrb[60].mxu0 %vm246_vm2, %v4276_v60 }
 0x7e7   :  { %7001 = vmatpush3.bf16.xpose.msk.msra.mxu0 %vm7609_vm3, %v6999_v1  ;;  %6712 = vmatprep.mubr.msk.f32.mxu0 %vm7465_vm1, %v7466_v23 }
 0x7e8   :  { %7006 = vmatprep.subr.bf16.mxu0 %v7464_v22 }
 0x7ea   :  { %6692 = vmatmul.mubr.msk.f32.vlgmr.msra.gmra.mrb[58].mxu1 %vm246_vm2, %v4276_v60 }
 0x7eb   :  { %6997 = vmatpush3.bf16.xpose.msk.msra.mxu1 %vm7609_vm3, %v6995_v31  ;;  %6705 = vmatprep.mubr.msk.f32.mxu1 %vm7465_vm1, %v7466_v23 }
 0x7ec   :  { %7002 = vmatprep.subr.bf16.mxu1 %v7464_v22 }
 0x7ee   :  { %6713 = vmatmul.mubr.msk.f32.vlgmr.msra.gmra.mrb[62].mxu0 %vm246_vm2, %v4276_v60 }
 0x7ef   :  { %6726 = vmatprep.mubr.msk.f32.mxu0 %vm7465_vm1, %v7466_v23 }
 0x7f2   :  { %6706 = vmatmul.mubr.msk.f32.vlgmr.msra.gmra.mrb[60].mxu1 %vm246_vm2, %v4276_v60 }
 0x7f3   :  { %7005 = vmatpush3.bf16.xpose.msk.msra.mxu1 %vm7609_vm3, %v7003_v46  ;;  %6719 = vmatprep.mubr.msk.f32.mxu1 %vm7465_vm1, %v7466_v23 }
 0x7f4   :  { %7009 = vmatprep.subr.bf16.mxu1 %v7464_v22 }
 0x7fa   :  { %6720 = vmatmul.mubr.msk.f32.vlgmr.msra.gmra.mrb[62].mxu1 %vm246_vm2, %v4276_v60 }
 0x7fb   :  { %6733 = vmatprep.mubr.msk.f32.mxu1 %vm7465_vm1, %v7466_v23 }
 0x85c   :  { %v8264_v47 = vpop.f32.mrb[48].mxu0 }
 0x85d   :  { %v6616_v6 = vpop.f32.mrb[49].mxu0 }
 0x864   :  { %v8266_v42 = vpop.f32.mrb[50].mxu0 }
 0x865   :  { %v6630_v54 = vpop.f32.mrb[51].mxu0 }
 0x868   :  { %v8268_v41 = vpop.f32.mrb[48].mxu1 }
 0x869   :  { %v6623_v33 = vpop.f32.mrb[49].mxu1 }
 0x86c   :  { %v8270_v28 = vpop.f32.mrb[52].mxu0 }
 0x86d   :  { %v6644_v2 = vpop.f32.mrb[53].mxu0 }
 0x870   :  { %v8272_v59 = vpop.f32.mrb[50].mxu1 }
 0x871   :  { %v6637_v45 = vpop.f32.mrb[51].mxu1 }
 0x878   :  { %v8274_v26 = vpop.f32.mrb[52].mxu1 }
 0x879   :  { %v6651_v61 = vpop.f32.mrb[53].mxu1 }
 0x8a1   :  { %v8276_v18 = vpop.f32.mrb[54].mxu0 }
 0x8a2   :  { %v6658_v35 = vpop.f32.mrb[55].mxu0 }
 0x8a9   :  { %v4353_v30 = vpop.f32.mrb[56].mxu0 }
 0x8aa   :  { %v4903_v60 = vsel %vm858_vm4, %v4353_v30, -inf  ;;  %v6672_v4 = vpop.f32.mrb[57].mxu0 }
 0x8ab   :  { %4904 = vmax.xlane.f32.xlu1 %v4903_v60 }
 0x8ad   :  { %v8279_v3 = vpop.f32.mrb[54].mxu1 }
 0x8ae   :  { %v6665_v37 = vpop.f32.mrb[55].mxu1 }
 0x8b1   :  { %v4509_v48 = vpop.f32.mrb[58].mxu0 }
 0x8b2   :  { %v4909_v13 = vsel %vm858_vm4, %v4509_v48, -inf  ;;  %v6686_v20 = vpop.f32.mrb[59].mxu0 }
 0x8b3   :  { %4910 = vmax.xlane.f32.xlu0 %v4909_v13 }
 0x8b5   :  { %v4431_v9 = vpop.f32.mrb[56].mxu1 }
 0x8b6   :  { %v4906_v24 = vsel %vm858_vm4, %v4431_v9, -inf  ;;  %v6679_v39 = vpop.f32.mrb[57].mxu1 }
 0x8b7   :  { %4907 = vmax.xlane.f32.xlu0 %v4906_v24 }
 0x8b9   :  { %v4665_v53 = vpop.f32.mrb[60].mxu0 }
 0x8ba   :  { %v4915_v38 = vsel %vm858_vm4, %v4665_v53, -inf  ;;  %v6700_v32 = vpop.f32.mrb[61].mxu0 }
 0x8bb   :  { %4916 = vmax.xlane.f32.xlu1 %v4915_v38 }
 0x8bd   :  { %v4587_v58 = vpop.f32.mrb[58].mxu1 }
 0x8be   :  { %v6693_v56 = vpop.f32.mrb[59].mxu1  ;;  %v4912_v55 = vsel %vm858_vm4, %v4587_v58, -inf }
 0x8bf   :  { %4913 = vmax.xlane.f32.xlu0 %v4912_v55 }
 0x8c1   :  { %v4821_v50 = vpop.f32.mrb[62].mxu0 }
 0x8c2   :  { %v6714_v1 = vpop.f32.mrb[63].mxu0  ;;  %v4921_v31 = vsel %vm858_vm4, %v4821_v50, -inf }
 0x8c3   :  { %4922 = vmax.xlane.f32.xlu1 %v4921_v31 }
 0x8c5   :  { %v4743_v43 = vpop.f32.mrb[60].mxu1 }
 0x8c6   :  { %v6707_v44 = vpop.f32.mrb[61].mxu1  ;;  %v4918_v0 = vsel %vm858_vm4, %v4743_v43, -inf }
 0x8c7   :  { %4919 = vmax.xlane.f32.xlu0 %v4918_v0 }
 0x8cd   :  { %v8287_v46 = vpop.f32.mrb[62].mxu1 }
 0x8ce   :  { %v6721_v6 = vpop.f32.mrb[63].mxu1  ;;  %v4924_v54 = vsel %vm858_vm4, %v8287_v46, -inf }
 0x8cf   :  { %4925 = vmax.xlane.f32.xlu0 %v4924_v54 }
 0x8d4   :  { %7296 = vrot.lane.b32.xlu1 %v7616_v36, %s7473_s19 }
 0x8d8   :  { %7306 = vrot.lane.b32.xlu1 %v7647_v57, %s7473_s19 }
 0x8dc   :  { %7311 = vrot.lane.b32.xlu1 %v7660_v63, %s7473_s19 }
 0x8e0   :  { %7316 = vrot.lane.b32.xlu1 %v7666_v5, %s7473_s19 }
 0x8e5   :  { %7301 = vrot.lane.b32.xlu0 %v7637_v49, %s7473_s19 }
 0x8e9   :  { %7321 = vrot.lane.b32.xlu0 %v7682_v11, %s7473_s19 }
 0x938   :  { %v4905_v33 = vpop.xlane.xlu1 %4904 }
 0x939   :  { %v4927_v2 = vsub.f32 %v4353_v30, %v4905_v33 }
 0x93b   :  { %v4935_v45 = vmul.f32 1.442695, %v4927_v2 }
 0x93d   :  { %7431 = vpow2.f32 %v4935_v45 }
 0x940   :  { %v4911_v36 = vpop.xlane.xlu0 %4910 }
 0x941   :  { %v4929_v61 = vsub.f32 %v4509_v48, %v4911_v36 }
 0x943   :  { %v4939_v35 = vmul.f32 1.442695, %v4929_v61 }
 0x944   :  { %v4908_v57 = vpop.xlane.xlu0 %4907 }
 0x945   :  { %7433 = vpow2.f32 %v4939_v35  ;;  %v4928_v60 = vsub.f32 %v4431_v9, %v4908_v57 }
 0x947   :  { %v8303_v63 = vpop.eup %7431  ;;  %v4937_v4 = vmul.f32 1.442695, %v4928_v60 }
 0x948   :  { %v4917_v5 = vpop.xlane.xlu1 %4916  ;;  %v4951_v49 = vsel %vm858_vm4, %v8303_v63, 0.0 }
 0x949   :  { %7435 = vpow2.f32 %v4937_v4  ;;  %v4931_v37 = vsub.f32 %v4665_v53, %v4917_v5  ;;  %4952 = vadd.xlane.f32.xlu1 %v4951_v49 }
 0x94b   :  { %v4943_v11 = vmul.f32 1.442695, %v4931_v37 }
 0x94c   :  { %v4914_v30 = vpop.xlane.xlu0 %4913 }
 0x94d   :  { %7437 = vpow2.f32 %v4943_v11  ;;  %v4930_v13 = vsub.f32 %v4587_v58, %v4914_v30 }
 0x94f   :  { %v8307_v20 = vpop.eup %7433  ;;  %v4941_v48 = vmul.f32 1.442695, %v4930_v13 }
 0x950   :  { %v4923_v24 = vpop.xlane.xlu1 %4922  ;;  %v4957_v9 = vsel %vm858_vm4, %v8307_v20, 0.0 }
 0x951   :  { %7439 = vpow2.f32 %v4941_v48  ;;  %v4933_v39 = vsub.f32 %v4821_v50, %v4923_v24  ;;  %4958 = vadd.xlane.f32.xlu1 %v4957_v9 }
 0x953   :  { %v8311_v38 = vpop.eup %7435  ;;  %v4947_v32 = vmul.f32 1.442695, %v4933_v39 }
 0x954   :  { %v7297_v56 = vpop.permute.xlu1 %7296  ;;  %v4920_v53 = vpop.xlane.xlu0 %4919  ;;  %v4954_v55 = vsel %vm858_vm4, %v8311_v38, 0.0 }
 0x955   :  { %7441 = vpow2.f32 %v4947_v32  ;;  %v7299_v58 = vunpack.i.h.bf16 %v7297_v56  ;;  %v7298_v1 = vunpack.i.l.bf16 %v7297_v56  ;;  %v4932_v31 = vsub.f32 %v4743_v43, %v4920_v53  ;;  %4955 = vadd.xlane.f32.xlu0 %v4954_v55 }
 0x957   :  { %v8315_v44 = vpop.eup %7437  ;;  %v7007_v0 = vpack.c.bf16 %v7299_v58, %v7298_v1  ;;  %v4945_v6 = vmul.f32 1.442695, %v4932_v31 }
 0x958   :  { %v4963_v50 = vsel %vm858_vm4, %v8315_v44, 0.0 }
 0x959   :  { %7443 = vpow2.f32 %v4945_v6  ;;  %4964 = vadd.xlane.f32.xlu1 %v4963_v50  ;;  %7008 = vmatpush3.bf16.msra.mxu0 %v7007_v0 }
 0x95a   :  { %7012 = vmatprep.subr.bf16.mxu0 %v7464_v22 }
 0x95b   :  { %v8320_v54 = vpop.eup %7439 }
 0x95c   :  { %v4926_v33 = vpop.xlane.xlu0 %4925  ;;  %v4960_v2 = vsel %vm858_vm4, %v8320_v54, 0.0 }
 0x95d   :  { %v4934_v43 = vsub.f32 %v8287_v46, %v4926_v33  ;;  %4961 = vadd.xlane.f32.xlu0 %v4960_v2 }
 0x95f   :  { %v8325_v45 = vpop.eup %7441  ;;  %v4949_v36 = vmul.f32 1.442695, %v4934_v43 }
 0x960   :  { %v7302_v61 = vpop.permute.xlu0 %7301  ;;  %v4969_v35 = vsel %vm858_vm4, %v8325_v45, 0.0 }
 0x961   :  { %7445 = vpow2.f32 %v4949_v36  ;;  %v7304_v57 = vunpack.i.h.bf16 %v7302_v61  ;;  %4970 = vadd.xlane.f32.xlu1 %v4969_v35  ;;  %v7303_v60 = vunpack.i.l.bf16 %v7302_v61 }
 0x963   :  { %v8329_v4 = vpop.eup %7443  ;;  %v7010_v5 = vpack.c.bf16 %v7304_v57, %v7303_v60  ;;  %v5753_v60 = vld [vmem:[%s8484_s4 + $0x8] sm:$0xff] }
 0x964   :  { %v4966_v49 = vsel %vm858_vm4, %v8329_v4, 0.0 }
 0x965   :  { %4967 = vadd.xlane.f32.xlu0 %v4966_v49  ;;  %7011 = vmatpush3.bf16.msra.mxu1 %v7010_v5  ;;  %v5755_v5 = vld [vmem:[%s8484_s4 + $0x18] sm:$0xff] }
 0x966   :  { %7015 = vmatprep.subr.bf16.mxu1 %v7464_v22 }
 0x96b   :  { %v8334_v46 = vpop.eup %7445 }
 0x96c   :  { %v4972_v37 = vsel %vm858_vm4, %v8334_v46, 0.0 }
 0x96d   :  { %4973 = vadd.xlane.f32.xlu0 %v4972_v37 }
 0x972   :  { %7326 = vrot.lane.b32.xlu1 %v7622_v40, %s7473_s19  ;;  %v7307_v40 = vpop.permute.xlu1 %7306 }
 0x976   :  { %5631 = vrot.lane.b32.xlu1 %v8089_v8, %s7474_s20 }
 0x97a   :  { %5663 = vrot.lane.b32.xlu1 %v8264_v47, %s7475_s21 }
 0x97e   :  { %5635 = vrot.lane.b32.xlu1 %v8091_v7, %s7474_s20 }
 0x982   :  { %5667 = vrot.lane.b32.xlu1 %v8266_v42, %s7475_s21 }
 0x983   :  { %7331 = vrot.lane.b32.xlu0 %v7641_v52, %s7473_s19  ;;  %v7312_v52 = vpop.permute.xlu1 %7311 }
 0x984   :  { %v7313_v11 = vunpack.i.l.bf16 %v7312_v52 }
 0x986   :  { %5639 = vrot.lane.b32.xlu1 %v8095_v17, %s7474_s20 }
 0x987   :  { %5633 = vrot.lane.b32.xlu0 %v8093_v15, %s7474_s20  ;;  %v7317_v8 = vpop.permute.xlu1 %7316  ;;  %v7322_v15 = vpop.permute.xlu0 %7321 }
 0x988   :  { %v7324_v39 = vunpack.i.h.bf16 %v7322_v15 }
 0x98a   :  { %5671 = vrot.lane.b32.xlu1 %v8270_v28, %s7475_s21  ;;  %v7319_v28 = vunpack.i.h.bf16 %v7317_v8 }
 0x98b   :  { %5665 = vrot.lane.b32.xlu0 %v8268_v41, %s7475_s21 }
 0x98e   :  { %5643 = vrot.lane.b32.xlu1 %v8099_v25, %s7474_s20  ;;  %v7308_v25 = vunpack.i.l.bf16 %v7307_v40 }
 0x98f   :  { %5637 = vrot.lane.b32.xlu0 %v8097_v12, %s7474_s20  ;;  %v7309_v12 = vunpack.i.h.bf16 %v7307_v40 }
 0x991   :  { %v7013_v41 = vpack.c.bf16 %v7309_v12, %v7308_v25 }
 0x992   :  { %5675 = vrot.lane.b32.xlu1 %v8276_v18, %s7475_s21 }
 0x993   :  { %5669 = vrot.lane.b32.xlu0 %v8272_v59, %s7475_s21  ;;  %v7318_v59 = vunpack.i.l.bf16 %v7317_v8 }
 0x995   :  { %v7019_v30 = vpack.c.bf16 %v7319_v28, %v7318_v59 }
 0x997   :  { %5641 = vrot.lane.b32.xlu0 %v8101_v27, %s7474_s20 }
 0x99b   :  { %5673 = vrot.lane.b32.xlu0 %v8274_v26, %s7475_s21 }
 0x99f   :  { %5645 = vrot.lane.b32.xlu0 %v8104_v34, %s7474_s20 }
 0x9a3   :  { %5677 = vrot.lane.b32.xlu0 %v8279_v3, %s7475_s21 }
 0x9d6   :  { %v4953_v7 = vpop.xlane.xlu1 %4952 }
 0x9d7   :  { %7447 = vrcp.f32 %v4953_v7 }
 0x9de   :  { %v4959_v17 = vpop.xlane.xlu1 %4958 }
 0x9df   :  { %7449 = vrcp.f32 %v4959_v17 }
 0x9e1   :  { %v7448_v47 = vpop.eup %7447 }
 0x9e2   :  { %v4983_v42 = vmul.f32 %v7448_v47, %v8303_v63  ;;  %v4956_v27 = vpop.xlane.xlu0 %4955  ;;  %v7314_v63 = vunpack.i.h.bf16 %v7312_v52 }
 0x9e3   :  { %7451 = vrcp.f32 %v4956_v27 }
 0x9e4   :  { %6727 = vmatmul.mubr.msk.f32.vlgmr.msra.gmra.mrb[64].mxu0 %vm858_vm4, %v4983_v42  ;;  %v7016_v9 = vpack.c.bf16 %v7314_v63, %v7313_v11 }
 0x9e5   :  { %7014 = vmatpush3.bf16.msra.mxu0 %v7013_v41  ;;  %6740 = vmatprep.mubr.msk.f32.mxu0 %vm7465_vm1, %v7466_v23 }
 0x9e6   :  { %v4965_v34 = vpop.xlane.xlu1 %4964  ;;  %7018 = vmatprep.subr.bf16.mxu0 %v7464_v22 }
 0x9e7   :  { %7453 = vrcp.f32 %v4965_v34 }
 0x9e9   :  { %v7450_v26 = vpop.eup %7449 }
 0x9ea   :  { %v4985_v18 = vmul.f32 %v7450_v26, %v8307_v20  ;;  %v4962_v3 = vpop.xlane.xlu0 %4961 }
 0x9eb   :  { %7455 = vrcp.f32 %v4962_v3 }
 0x9ec   :  { %6741 = vmatmul.mubr.msk.f32.vlgmr.msra.gmra.mrb[66].mxu0 %vm858_vm4, %v4985_v18 }
 0x9ed   :  { %v7452_v13 = vpop.eup %7451  ;;  %7020 = vmatpush3.bf16.msra.mxu0 %v7019_v30  ;;  %6754 = vmatprep.mubr.msk.f32.mxu0 %vm7465_vm1, %v7466_v23 }
 0x9ee   :  { %v4984_v48 = vmul.f32 %v7452_v13, %v8311_v38  ;;  %v4971_v24 = vpop.xlane.xlu1 %4970  ;;  %7024 = vmatprep.subr.bf16.mxu0 %v7464_v22  ;;  %v7323_v38 = vunpack.i.l.bf16 %v7322_v15 }
 0x9ef   :  { %7457 = vrcp.f32 %v4971_v24 }
 0x9f0   :  { %6734 = vmatmul.mubr.msk.f32.vlgmr.msra.gmra.mrb[64].mxu1 %vm858_vm4, %v4984_v48  ;;  %v7022_v6 = vpack.c.bf16 %v7324_v39, %v7323_v38 }
 0x9f1   :  { %v7454_v20 = vpop.eup %7453  ;;  %7017 = vmatpush3.bf16.msra.mxu1 %v7016_v9  ;;  %6747 = vmatprep.mubr.msk.f32.mxu1 %vm7465_vm1, %v7466_v23 }
 0x9f2   :  { %v4987_v32 = vmul.f32 %v7454_v20, %v8315_v44  ;;  %v7327_v56 = vpop.permute.xlu1 %7326  ;;  %v4968_v53 = vpop.xlane.xlu0 %4967  ;;  %7021 = vmatprep.subr.bf16.mxu1 %v7464_v22 }
 0x9f3   :  { %v7329_v55 = vunpack.i.h.bf16 %v7327_v56  ;;  %v7328_v58 = vunpack.i.l.bf16 %v7327_v56  ;;  %7459 = vrcp.f32 %v4968_v53 }
 0x9f4   :  { %6755 = vmatmul.mubr.msk.f32.vlgmr.msra.gmra.mrb[68].mxu0 %vm858_vm4, %v4987_v32 }
 0x9f5   :  { %v7456_v1 = vpop.eup %7455  ;;  %v7025_v31 = vpack.c.bf16 %v7329_v55, %v7328_v58  ;;  %6768 = vmatprep.mubr.msk.f32.mxu0 %vm7465_vm1, %v7466_v23 }
 0x9f6   :  { %v4986_v0 = vmul.f32 %v7456_v1, %v8320_v54  ;;  %v5632_v59 = vpop.permute.xlu1 %5631  ;;  %v7463_v1 = vld [vmem:[%s8483_s0] sm:$0xff] }
 0x9f7   :  { %7026 = vmatpush3.bf16.msra.mxu0 %v7025_v31  ;;  %v5719_v56 = vsel %vm246_vm2, %v7883_v10, %v5632_v59 }
 0x9f8   :  { %6748 = vmatmul.mubr.msk.f32.vlgmr.msra.gmra.mrb[66].mxu1 %vm858_vm4, %v4986_v0 }
 0x9f9   :  { %v7458_v44 = vpop.eup %7457  ;;  %7023 = vmatpush3.bf16.msra.mxu1 %v7022_v6  ;;  %6761 = vmatprep.mubr.msk.f32.mxu1 %vm7465_vm1, %v7466_v23 }
 0x9fa   :  { %v4989_v50 = vmul.f32 %v7458_v44, %v8325_v45  ;;  %v4974_v33 = vpop.xlane.xlu0 %4973  ;;  %7027 = vmatprep.subr.bf16.mxu1 %v7464_v22  ;;  %v5752_v22 = vld [vmem:[%s8484_s4] sm:$0xff]  ;;  %v5664_v26 = vpop.permute.xlu1 %5663 }
 0x9fb   :  { %7461 = vrcp.f32 %v4974_v33  ;;  %v5727_v53 = vsel %vm858_vm4, %v5719_v56, %v5664_v26 }
 0x9fc   :  { %6769 = vmatmul.mubr.msk.f32.vlgmr.msra.gmra.mrb[70].mxu0 %vm858_vm4, %v4989_v50 }
 0x9fd   :  { %v7460_v2 = vpop.eup %7459 }
 0x9fe   :  { %v4988_v54 = vmul.f32 %v7460_v2, %v8329_v4  ;;  %v7332_v43 = vpop.permute.xlu0 %7331  ;;  %v7030_v4 = vpack.c.bf16 %v5753_v60, %v5752_v22  ;;  %v5636_v18 = vpop.permute.xlu1 %5635 }
 0x9ff   :  { %v7334_v36 = vunpack.i.h.bf16 %v7332_v43  ;;  %v7333_v61 = vunpack.i.l.bf16 %v7332_v43  ;;  %v5721_v44 = vsel %vm246_vm2, %v7887_v14, %v5636_v18 }
 0xa00   :  { %6762 = vmatmul.mubr.msk.f32.vlgmr.msra.gmra.mrb[68].mxu1 %vm858_vm4, %v4988_v54  ;;  %7031 = vmatprep.subr.bf16.mxu0 %v7030_v4 }
 0xa01   :  { %v7028_v35 = vpack.c.bf16 %v7334_v36, %v7333_v61  ;;  %6775 = vmatprep.mubr.msk.f32.mxu1 %vm7465_vm1, %v7466_v23  ;;  %7033 = vmatpush3.bf16.msra.mxu0 %v7030_v4  ;;  %v5754_v23 = vld [vmem:[%s8484_s4 + $0x10] sm:$0xff] }
 0xa02   :  { %v7034_v49 = vpack.c.bf16 %v5755_v5, %v5754_v23  ;;  %v5634_v3 = vpop.permute.xlu0 %5633  ;;  %v5668_v63 = vpop.permute.xlu1 %5667 }
 0xa03   :  { %7029 = vmatpush3.bf16.msra.mxu1 %v7028_v35  ;;  %v5729_v10 = vsel %vm858_vm4, %v5721_v44, %v5668_v63  ;;  %v5720_v50 = vsel %vm246_vm2, %v7885_v51, %v5634_v3 }
 0xa04   :  { %7035 = vmatprep.subr.bf16.mxu0 %v7034_v49 }
 0xa05   :  { %v7462_v45 = vpop.eup %7461  ;;  %7037 = vmatpush3.bf16.msra.mxu0 %v7034_v49 }
 0xa06   :  { %v4990_v57 = vmul.f32 %v7462_v45, %v8334_v46  ;;  %v5666_v11 = vpop.permute.xlu0 %5665  ;;  %v5640_v30 = vpop.permute.xlu1 %5639 }
 0xa07   :  { %v5728_v33 = vsel %vm858_vm4, %v5720_v50, %v5666_v11  ;;  %v5723_v14 = vsel %vm246_vm2, %v7889_v16, %v5640_v30 }
 0xa08   :  { %6776 = vmatmul.mubr.msk.f32.vlgmr.msra.gmra.mrb[70].mxu1 %vm858_vm4, %v4990_v57 }
 0xa0a   :  { %v5638_v13 = vpop.permute.xlu0 %5637  ;;  %v5672_v48 = vpop.permute.xlu1 %5671 }
 0xa0b   :  { %v5731_v45 = vsel %vm858_vm4, %v5723_v14, %v5672_v48  ;;  %v5722_v51 = vsel %vm246_vm2, %v7891_v62, %v5638_v13 }
 0xa0e   :  { %v5670_v24 = vpop.permute.xlu0 %5669  ;;  %v5644_v9 = vpop.permute.xlu1 %5643 }
 0xa0f   :  { %v5730_v57 = vsel %vm858_vm4, %v5722_v51, %v5670_v24  ;;  %v5725_v16 = vsel %vm246_vm2, %v7895_v21, %v5644_v9 }
 0xa12   :  { %v5642_v20 = vpop.permute.xlu0 %5641  ;;  %v5676_v39 = vpop.permute.xlu1 %5675 }
 0xa13   :  { %v5724_v62 = vsel %vm246_vm2, %v7893_v19, %v5642_v20 }
 0xa16   :  { %v5674_v32 = vpop.permute.xlu0 %5673 }
 0xa1a   :  { %v5646_v58 = vpop.permute.xlu0 %5645 }
 0xa1b   :  { %v5726_v21 = vsel %vm246_vm2, %v7898_v29, %v5646_v58 }
 0xa1e   :  { %v5678_v0 = vpop.permute.xlu0 %5677 }
 0xab7   :  { %v5066_v46 = vpop.f32.mrb[64].mxu0 }
 0xab8   :  { %5695 = vrot.lane.b32.xlu1 %v5066_v46, %s7476_s30  ;;  %v6728_v37 = vpop.f32.mrb[65].mxu0  ;;  %v5733_v46 = vsel %vm858_vm4, %v5725_v16, %v5676_v39 }
 0xab9   :  { %v5732_v37 = vsel %vm858_vm4, %v5724_v62, %v5674_v32 }
 0xabf   :  { %v5224_v40 = vpop.f32.mrb[66].mxu0 }
 0xac0   :  { %5699 = vrot.lane.b32.xlu1 %v5224_v40, %s7476_s30  ;;  %v6742_v52 = vpop.f32.mrb[67].mxu0 }
 0xac3   :  { %v5145_v8 = vpop.f32.mrb[64].mxu1 }
 0xac4   :  { %5697 = vrot.lane.b32.xlu0 %v5145_v8, %s7476_s30  ;;  %v6735_v7 = vpop.f32.mrb[65].mxu1 }
 0xac7   :  { %v5382_v15 = vpop.f32.mrb[68].mxu0 }
 0xac8   :  { %5703 = vrot.lane.b32.xlu1 %v5382_v15, %s7476_s30  ;;  %v6756_v17 = vpop.f32.mrb[69].mxu0 }
 0xac9   :  { %v5734_v17 = vsel %vm858_vm4, %v5726_v21, %v5678_v0 }
 0xacb   :  { %v5303_v12 = vpop.f32.mrb[66].mxu1 }
 0xacc   :  { %5701 = vrot.lane.b32.xlu0 %v5303_v12, %s7476_s30  ;;  %v6749_v25 = vpop.f32.mrb[67].mxu1 }
 0xacf   :  { %v5540_v47 = vpop.f32.mrb[70].mxu0 }
 0xad0   :  { %5707 = vrot.lane.b32.xlu1 %v5540_v47, %s7476_s30  ;;  %v6770_v42 = vpop.f32.mrb[71].mxu0  ;;  %v6065_v47 = vld [vmem:[%s8485_s5] ss:$0 sm:$0xff] }
 0xad3   :  { %v5461_v27 = vpop.f32.mrb[68].mxu1 }
 0xad4   :  { %5705 = vrot.lane.b32.xlu0 %v5461_v27, %s7476_s30  ;;  %v6763_v41 = vpop.f32.mrb[69].mxu1 }
 0xadb   :  { %v5619_v34 = vpop.f32.mrb[70].mxu1 }
 0xadc   :  { %5709 = vrot.lane.b32.xlu0 %v5619_v34, %s7476_s30  ;;  %v6777_v28 = vpop.f32.mrb[71].mxu1 }
 0xb2a   :  { %v5696_v38 = vpop.permute.xlu1 %5695 }
 0xb2b   :  { %v5736_v55 = vsel %vm5735_vm5, %v5727_v53, %v5696_v38 }
 0xb2c   :  { %v5744_v31 = vadd.f32 %v7463_v1, %v5736_v55 }
 0xb2e   :  { %6786 = vmatprep.mubr.msk.f32.mxu0 %vm50_vm0, %v5744_v31 }
 0xb32   :  { %v5700_v6 = vpop.permute.xlu1 %5699 }
 0xb33   :  { %v5738_v2 = vsel %vm5735_vm5, %v5729_v10, %v5700_v6 }
 0xb34   :  { %v5746_v61 = vadd.f32 %v7463_v1, %v5738_v2 }
 0xb36   :  { %v5698_v54 = vpop.permute.xlu0 %5697 }
 0xb37   :  { %v5737_v43 = vsel %vm5735_vm5, %v5728_v33, %v5698_v54 }
 0xb38   :  { %v5745_v36 = vadd.f32 %v7463_v1, %v5737_v43 }
 0xb3a   :  { %6787 = vmatmul.mubr.msk.f32.vlgmr.msra.gmra.mrb[72].mxu0 %vm50_vm0, %v5745_v36  ;;  %v5704_v35 = vpop.permute.xlu1 %5703 }
 0xb3b   :  { %6789 = vmatprep.mubr.msk.f32.mxu0 %vm50_vm0, %v5746_v61  ;;  %v5740_v22 = vsel %vm5735_vm5, %v5731_v45, %v5704_v35 }
 0xb3c   :  { %v5748_v5 = vadd.f32 %v7463_v1, %v5740_v22 }
 0xb3e   :  { %v5702_v60 = vpop.permute.xlu0 %5701 }
 0xb3f   :  { %v5739_v4 = vsel %vm5735_vm5, %v5730_v57, %v5702_v60 }
 0xb40   :  { %v5747_v23 = vadd.f32 %v7463_v1, %v5739_v4 }
 0xb42   :  { %6790 = vmatmul.mubr.msk.f32.gmra.mrb[74].mxu0 %vm50_vm0, %v5747_v23  ;;  %v5708_v49 = vpop.permute.xlu1 %5707 }
 0xb43   :  { %6792 = vmatprep.mubr.msk.f32.mxu0 %vm50_vm0, %v5748_v5  ;;  %v5742_v40 = vsel %vm5735_vm5, %v5733_v46, %v5708_v49 }
 0xb44   :  { %v5750_v15 = vadd.f32 %v7463_v1, %v5742_v40 }
 0xb46   :  { %v5706_v52 = vpop.permute.xlu0 %5705 }
 0xb47   :  { %v5741_v8 = vsel %vm5735_vm5, %v5732_v37, %v5706_v52 }
 0xb48   :  { %v5749_v7 = vadd.f32 %v7463_v1, %v5741_v8 }
 0xb4a   :  { %6793 = vmatmul.mubr.msk.f32.gmra.mrb[76].mxu0 %vm50_vm0, %v5749_v7 }
 0xb4b   :  { %6795 = vmatprep.mubr.msk.f32.mxu0 %vm50_vm0, %v5750_v15 }
 0xb4e   :  { %v5710_v12 = vpop.permute.xlu0 %5709 }
 0xb4f   :  { %v5743_v19 = vsel %vm5735_vm5, %v5734_v17, %v5710_v12 }
 0xb50   :  { %v5751_v25 = vadd.f32 %v7463_v1, %v5743_v19 }
 0xb52   :  { %6796 = vmatmul.mubr.msk.f32.gmra.mrb[78].mxu0 %vm50_vm0, %v5751_v25 }
 0xc0d   :  { %v6788_v42 = vpop.f32.mrb[72].mxu0 }
 0xc0e   :  { %v5859_v27 = vadd.f32 %v6788_v42, %v6065_v47  ;;  %v5853_v41 = vpop.f32.mrb[73].mxu0 }
 0xc0f   :  { %v5854_v34 = vadd.f32 %v6065_v47, %v5853_v41 }
 0xc10   :  { %v5893_v28 = vmax.f32 %v5859_v27, 0.0 }
 0xc11   :  { %v5892_v59 = vmax.f32 %v5854_v34, 0.0 }
 0xc12   :  { %v5901_v26 = vadd.f32 %v5893_v28, %v5745_v36 }
 0xc13   :  { %v5900_v29 = vadd.f32 %v5892_v59, %v5744_v31 }
 0xc14   :  { %5909 = vst.msk [vmem:[%s8486_s6 + $0x8] sm:$0xff] %vm50_vm0, %v5901_v26 }
 0xc15   :  { %5908 = vst.msk [vmem:[%s8486_s6] sm:$0xff] %vm50_vm0, %v5900_v29  ;;  %v6791_v18 = vpop.f32.mrb[74].mxu0 }
 0xc16   :  { %v5869_v3 = vadd.f32 %v6791_v18, %v6065_v47  ;;  %v5863_v63 = vpop.f32.mrb[75].mxu0 }
 0xc17   :  { %v5864_v11 = vadd.f32 %v6065_v47, %v5863_v63 }
 0xc18   :  { %v5895_v30 = vmax.f32 %v5869_v3, 0.0 }
 0xc19   :  { %v5894_v13 = vmax.f32 %v5864_v11, 0.0 }
 0xc1a   :  { %v5903_v48 = vadd.f32 %v5895_v30, %v5747_v23 }
 0xc1b   :  { %v5902_v24 = vadd.f32 %v5894_v13, %v5746_v61 }
 0xc1c   :  { %5911 = vst.msk [vmem:[%s8486_s6 + $0x18] sm:$0xff] %vm50_vm0, %v5903_v48 }
 0xc1d   :  { %5910 = vst.msk [vmem:[%s8486_s6 + $0x10] sm:$0xff] %vm50_vm0, %v5902_v24  ;;  %v6794_v9 = vpop.f32.mrb[76].mxu0 }
 0xc1e   :  { %v5879_v20 = vadd.f32 %v6794_v9, %v6065_v47  ;;  %v5873_v39 = vpop.f32.mrb[77].mxu0 }
 0xc1f   :  { %v5874_v32 = vadd.f32 %v6065_v47, %v5873_v39 }
 0xc20   :  { %v5897_v56 = vmax.f32 %v5879_v20, 0.0 }
 0xc21   :  { %v5896_v53 = vmax.f32 %v5874_v32, 0.0 }
 0xc22   :  { %v5905_v38 = vadd.f32 %v5897_v56, %v5749_v7 }
 0xc23   :  { %v5904_v55 = vadd.f32 %v5896_v53, %v5748_v5 }
 0xc24   :  { %5913 = vst.msk [vmem:[%s8486_s6 + $0x28] sm:$0xff] %vm50_vm0, %v5905_v38 }
 0xc25   :  { %5912 = vst.msk [vmem:[%s8486_s6 + $0x20] sm:$0xff] %vm50_vm0, %v5904_v55  ;;  %v6797_v58 = vpop.f32.mrb[78].mxu0 }
 0xc26   :  { %v5889_v1 = vadd.f32 %v6797_v58, %v6065_v47  ;;  %v5883_v31 = vpop.f32.mrb[79].mxu0 }
 0xc27   :  { %v5884_v0 = vadd.f32 %v6065_v47, %v5883_v31 }
 0xc28   :  { %v5899_v6 = vmax.f32 %v5889_v1, 0.0 }
 0xc29   :  { %v5898_v44 = vmax.f32 %v5884_v0, 0.0 }
 0xc2a   :  { %v5907_v10 = vadd.f32 %v5899_v6, %v5751_v25 }
 0xc2b   :  { %v5906_v50 = vadd.f32 %v5898_v44, %v5750_v15 }
 0xc2c   :  { %5915 = vst.msk [vmem:[%s8486_s6 + $0x38] sm:$0xff] %vm50_vm0, %v5907_v10 }
 0xc2d   :  { %5914 = vst.msk [vmem:[%s8486_s6 + $0x30] sm:$0xff] %vm50_vm0, %v5906_v50 }

</bundles_post_ra>
